<compile_context>
chip_gen: v5e
topology: v5e:2x2
jax: 0.10.0
libtpu: 0.0.40
codegen_flags: <defaults>
</compile_context>

<pallas_src>
import functools

import jax
import jax.numpy as jnp
from jax.experimental import pallas as pl
from jax.experimental.pallas import tpu as pltpu


def _fold_bn(bn, eps):
    s = bn["gamma"] / jnp.sqrt(bn["var"] + eps)
    b = bn["beta"] - bn["mean"] * s
    return s, b


# ----------------------------------------------------------------------------
# Fused bottleneck kernel: one grid step = one full output frame (n, t)
# ----------------------------------------------------------------------------
def _bottleneck_kernel(*refs, temp_kernel_size, t_frames, t_out, dilation,
                       stride_3x3, h_out1, w_out1, h_out2, w_out2):
    """refs = (x_tap_0 .. x_tap_{Kt-1}, wa, wb, wc, ba, bb, bc, o, acc, pad).

    acc_ref : (HW1, Ci) f32 accumulator for the Tx1x1 conv (in-kernel tap loop).
    pad_ref : (H1+2d, W1+2d, Ci) bf16 zero-bordered frame for the 1x3x3 conv.
    """
    Kt = temp_kernel_size
    pt = Kt // 2
    d = dilation
    s3 = stride_3x3

    x_refs = refs[:Kt]
    (wa_ref, wb_ref, wc_ref, ba_ref, bb_ref, bc_ref,
     o_ref, acc_ref, pad_ref) = refs[Kt:]

    t = pl.program_id(1)

    # ---- stage a: Tx1x1 conv (BN-a scale folded into wa), taps in-kernel ----
    acc_ref[...] = jnp.zeros_like(acc_ref)
    for k in range(Kt):
        off = k - pt

        def _tap(k=k):
            acc_ref[...] += jnp.dot(x_refs[k][0, 0], wa_ref[k],
                                    preferred_element_type=jnp.float32)

        # Only taps that can actually fall outside [0, T) get a predicate;
        # the clamped index_map re-reads a valid frame whose contribution we skip.
        conds = []
        if off < 0:
            conds.append(t + off >= 0)
        if (t_out - 1) + off > t_frames - 1:
            conds.append(t + off <= t_frames - 1)
        if conds:
            pred = conds[0]
            for c in conds[1:]:
                pred = jnp.logical_and(pred, c)
            pl.when(pred)(_tap)
        else:
            _tap()

    ci = acc_ref.shape[-1]
    ya = jnp.maximum(acc_ref[...] + ba_ref[...], 0.0)           # (HW1, Ci) f32

    # ---- stage-b input: zero-bordered bf16 frame in VMEM (border-only zeroing) ----
    hp, wp = h_out1 + 2 * d, w_out1 + 2 * d
    zrow = jnp.zeros((d, wp, ci), jnp.bfloat16)
    zcol = jnp.zeros((hp, d, ci), jnp.bfloat16)
    pad_ref[:d, :, :] = zrow
    pad_ref[d + h_out1:, :, :] = zrow
    pad_ref[:, :d, :] = zcol
    pad_ref[:, d + w_out1:, :] = zcol
    pad_ref[d:d + h_out1, d:d + w_out1, :] = (
        ya.astype(jnp.bfloat16).reshape(h_out1, w_out1, ci))

    # ---- stage b: 1x3x3 conv (BN-b scale folded), taps = shifted VMEM windows ----
    acc_b = jnp.zeros((h_out2 * w_out2, ci), jnp.float32)
    for kh in range(3):
        for kw in range(3):
            if s3 == 1:
                win = pad_ref[kh * d: kh * d + h_out2,
                              kw * d: kw * d + w_out2, :]
            else:
                win = pad_ref[pl.ds(kh * d, h_out2, stride=s3),
                              pl.ds(kw * d, w_out2, stride=s3), :]
            acc_b += jnp.dot(win.reshape(h_out2 * w_out2, ci), wb_ref[kh, kw],
                             preferred_element_type=jnp.float32)
    yb = jnp.maximum(acc_b + bb_ref[...], 0.0)                  # (HW2, Ci) f32

    # ---- stage c: 1x1x1 conv (BN-c scale folded) + BN-c bias, no ReLU --------
    yc = jnp.dot(yb.astype(jnp.bfloat16), wc_ref[...],
                 preferred_element_type=jnp.float32) + bc_ref[...]
    o_ref[0, 0] = yc.astype(o_ref.dtype)


# ----------------------------------------------------------------------------
# Wrapper: NCDHW in / NCDHW out, layout + BN folding in JAX, compute in Pallas
# ----------------------------------------------------------------------------
def bottleneck_transform_forward(x_ncdhw, params, *, temp_kernel_size, stride,
                                 dim_inner, dim_out, dilation=1, num_groups=1,
                                 stride_1x1=False, eps=1e-5):
    assert num_groups == 1  # TODO(synk): grouped (ResNeXt) 1x3x3 conv not implemented
    str1x1, str3x3 = (stride, 1) if stride_1x1 else (1, stride)

    x = jnp.transpose(x_ncdhw, (0, 2, 3, 4, 1))                      # N, T, H, W, C
    N, T, H, W, Cin = x.shape
    x = x[:, :, ::str1x1, ::str1x1, :]        # spatial stride of the 1x1 conv
    Ho1, Wo1 = x.shape[2], x.shape[3]
    HW1 = Ho1 * Wo1

    Kt = temp_kernel_size
    pt = Kt // 2
    T_out = T + 2 * pt - Kt + 1
    d = dilation
    Ho2 = (Ho1 - 1) // str3x3 + 1
    Wo2 = (Wo1 - 1) // str3x3 + 1
    HW2 = Ho2 * Wo2

    # flatten spatial, cast to bf16 (MXU-native). NO temporal jnp.pad pass.
    xf = x.reshape(N, T, HW1, Cin).astype(jnp.bfloat16)

    # fold eval-mode BN scales into the conv weights; keep biases as f32 rows
    sa, ba = _fold_bn(params["a_bn"], eps)
    sb, bb = _fold_bn(params["b_bn"], eps)
    sc, bc = _fold_bn(params["c_bn"], eps)

    wa = jnp.transpose(params["a_w"][:, :, :, 0, 0], (2, 1, 0))      # (Kt, Cin, Ci)
    wa = (wa * sa[None, None, :]).astype(jnp.bfloat16)
    wb = jnp.transpose(params["b_w"][:, :, 0, :, :], (2, 3, 1, 0))   # (3, 3, Ci, Ci)
    wb = (wb * sb[None, None, None, :]).astype(jnp.bfloat16)
    wc = (params["c_w"][:, :, 0, 0, 0].T * sc[None, :]).astype(jnp.bfloat16)  # (Ci, Co)

    ba2 = ba.reshape(1, dim_inner).astype(jnp.float32)
    bb2 = bb.reshape(1, dim_inner).astype(jnp.float32)
    bc2 = bc.reshape(1, dim_out).astype(jnp.float32)

    kernel = functools.partial(
        _bottleneck_kernel, temp_kernel_size=Kt, t_frames=T, t_out=T_out,
        dilation=d, stride_3x3=str3x3,
        h_out1=Ho1, w_out1=Wo1, h_out2=Ho2, w_out2=Wo2)

    # per-tap shifted frame, clamped at the temporal boundary (no padded input copy)
    def frame_spec(k):
        off = k - pt

        def idx(n, t, off=off):
            ts = jnp.minimum(jnp.maximum(t + off, 0), T - 1)
            return (n, ts, 0, 0)

        return pl.BlockSpec((1, 1, HW1, Cin), idx)

    in_specs = [frame_spec(k) for k in range(Kt)] + [
        # VMEM-resident weights (constant index maps) + folded BN biases
        pl.BlockSpec((Kt, Cin, dim_inner), lambda n, t: (0, 0, 0)),
        pl.BlockSpec((3, 3, dim_inner, dim_inner), lambda n, t: (0, 0, 0, 0)),
        pl.BlockSpec((dim_inner, dim_out), lambda n, t: (0, 0)),
        pl.BlockSpec((1, dim_inner), lambda n, t: (0, 0)),
        pl.BlockSpec((1, dim_inner), lambda n, t: (0, 0)),
        pl.BlockSpec((1, dim_out), lambda n, t: (0, 0)),
    ]

    flops = 2 * N * T_out * (HW1 * Kt * Cin * dim_inner
                             + HW2 * 9 * dim_inner * dim_inner
                             + HW2 * dim_inner * dim_out)
    bytes_accessed = (N * T_out * Kt * HW1 * Cin * 2          # Kt-fold frame reads
                      + (wa.size + wb.size + wc.size) * 2     # weights fetched once
                      + (ba2.size + bb2.size + bc2.size) * 4
                      + N * T_out * HW2 * dim_out * 4)        # f32 output writeback

    # VMEM budget from the actual block shapes of this launch (v7x: 64 MiB/TC)
    scratch_bytes = (HW1 * dim_inner * 4
                     + (Ho1 + 2 * d) * (Wo1 + 2 * d) * dim_inner * 2)
    block_bytes = (2 * (Kt * HW1 * Cin * 2 + HW2 * dim_out * 4)       # dbl-buffered act
                   + 2 * ((wa.size + wb.size + wc.size) * 2
                          + (ba2.size + bb2.size + bc2.size) * 4)
                   + scratch_bytes)
    vmem_limit = int(min(max(32 << 20, block_bytes * 3 // 2), 100 << 20))

    out = pl.pallas_call(
        kernel,
        out_shape=jax.ShapeDtypeStruct((N, T_out, HW2, dim_out), jnp.float32),
        grid=(N, T_out),
        in_specs=in_specs,
        out_specs=pl.BlockSpec((1, 1, HW2, dim_out), lambda n, t: (n, t, 0, 0)),
        scratch_shapes=[
            pltpu.VMEM((HW1, dim_inner), jnp.float32),                      # stage-a acc
            pltpu.VMEM((Ho1 + 2 * d, Wo1 + 2 * d, dim_inner), jnp.bfloat16),  # padded frame
        ],
        compiler_params=pltpu.CompilerParams(
            dimension_semantics=("parallel", "parallel"),
            vmem_limit_bytes=vmem_limit),
        cost_estimate=pl.CostEstimate(flops=int(flops), transcendentals=0,
                                      bytes_accessed=int(bytes_accessed)),
    )(*([xf] * Kt), wa, wb, wc, ba2, bb2, bc2)

    out = out.reshape(N, T_out, Ho2, Wo2, dim_out)
    return jnp.transpose(out, (0, 4, 1, 2, 3))                       # back to NCDHW


# ----------------------------------------------------------------------------
# Pure-JAX reference (lax.conv) for a silent correctness check
# ----------------------------------------------------------------------------
def reference_forward(x, params, *, temp_kernel_size, stride, dilation=1,
                      stride_1x1=False, eps=1e-5):
    str1x1, str3x3 = (stride, 1) if stride_1x1 else (1, stride)
    dn = ("NCDHW", "OIDHW", "NCDHW")

    def bn(y, p):
        sh = (1, -1, 1, 1, 1)
        return ((y - p["mean"].reshape(sh)) / jnp.sqrt(p["var"].reshape(sh) + eps)
                * p["gamma"].reshape(sh) + p["beta"].reshape(sh))

    y = jax.lax.conv_general_dilated(
        x, params["a_w"], window_strides=(1, str1x1, str1x1),
        padding=((temp_kernel_size // 2,) * 2, (0, 0), (0, 0)),
        dimension_numbers=dn, precision=jax.lax.Precision.HIGHEST)
    y = jax.nn.relu(bn(y, params["a_bn"]))
    y = jax.lax.conv_general_dilated(
        y, params["b_w"], window_strides=(1, str3x3, str3x3),
        padding=((0, 0), (dilation, dilation), (dilation, dilation)),
        rhs_dilation=(1, dilation, dilation),
        dimension_numbers=dn, precision=jax.lax.Precision.HIGHEST)
    y = jax.nn.relu(bn(y, params["b_bn"]))
    y = jax.lax.conv_general_dilated(
        y, params["c_w"], window_strides=(1, 1, 1),
        padding=((0, 0), (0, 0), (0, 0)),
        dimension_numbers=dn, precision=jax.lax.Precision.HIGHEST)
    return bn(y, params["c_bn"])


# ----------------------------------------------------------------------------
def _make_params(key, dim_in, dim_inner, dim_out, temp_kernel_size):
    ks = jax.random.split(key, 16)

    def bn_params(k, c):
        k1, k2, k3, k4 = jax.random.split(k, 4)
        return {
            "gamma": 1.0 + 0.1 * jax.random.normal(k1, (c,), jnp.float32),
            "beta": 0.1 * jax.random.normal(k2, (c,), jnp.float32),
            "mean": 0.05 * jax.random.normal(k3, (c,), jnp.float32),
            "var": 1.0 + 0.1 * jnp.abs(jax.random.normal(k4, (c,), jnp.float32)),
        }

    return {
        "a_w": 0.1 * jax.random.normal(
            ks[0], (dim_inner, dim_in, temp_kernel_size, 1, 1), jnp.float32),
        "a_bn": bn_params(ks[1], dim_inner),
        "b_w": 0.1 * jax.random.normal(
            ks[2], (dim_inner, dim_inner, 1, 3, 3), jnp.float32),
        "b_bn": bn_params(ks[3], dim_inner),
        "c_w": 0.1 * jax.random.normal(
            ks[4], (dim_out, dim_inner, 1, 1, 1), jnp.float32),
        "c_bn": bn_params(ks[5], dim_out),
    }


if __name__ == "__main__":
    # Small config consistent with the module's __init__ (standard ResNet case).
    N, dim_in, T, H, W = 2, 8, 4, 8, 8
    dim_inner, dim_out = 8, 16
    temp_kernel_size, stride, dilation, num_groups = 3, 1, 1, 1

    key = jax.random.PRNGKey(0)
    kx, kp = jax.random.split(key)
    x = jax.random.normal(kx, (N, dim_in, T, H, W), jnp.float32)  # NCDHW
    params = _make_params(kp, dim_in, dim_inner, dim_out, temp_kernel_size)

    out = bottleneck_transform_forward(
        x, params, temp_kernel_size=temp_kernel_size, stride=stride,
        dim_inner=dim_inner, dim_out=dim_out, dilation=dilation,
        num_groups=num_groups, stride_1x1=False, eps=1e-5)
    out = jax.block_until_ready(out)

    ref = reference_forward(
        x, params, temp_kernel_size=temp_kernel_size, stride=stride,
        dilation=dilation, stride_1x1=False, eps=1e-5)
    ref = jax.block_until_ready(ref)

    assert out.shape == ref.shape == (N, dim_out, T, H, W)
    # bf16 MXU matmuls (f32 accumulation) vs. f32 HIGHEST-precision reference
    assert jnp.allclose(out, ref, atol=5e-2, rtol=5e-2)
    print("KERNEL_OK")
</pallas_src>

<mosaic_0001>
module attributes {stable_mosaic.version = 11 : i64} {
  func.func @_bottleneck_kernel(%arg0: i32, %arg1: i32, %arg2: memref<1x1x64x8xbf16, #tpu.memory_space<vmem>>, %arg3: memref<1x1x64x8xbf16, #tpu.memory_space<vmem>>, %arg4: memref<1x1x64x8xbf16, #tpu.memory_space<vmem>>, %arg5: memref<3x8x8xbf16, #tpu.memory_space<vmem>>, %arg6: memref<3x3x8x8xbf16, #tpu.memory_space<vmem>>, %arg7: memref<8x16xbf16, #tpu.memory_space<vmem>>, %arg8: memref<1x8xf32, #tpu.memory_space<vmem>>, %arg9: memref<1x8xf32, #tpu.memory_space<vmem>>, %arg10: memref<1x16xf32, #tpu.memory_space<vmem>>, %arg11: memref<1x1x64x16xf32, #tpu.memory_space<vmem>>, %arg12: memref<64x8xf32, #tpu.memory_space<vmem>>, %arg13: memref<10x10x8xbf16, #tpu.memory_space<vmem>>) attributes {dimension_semantics = [#tpu.dimension_semantics<parallel>, #tpu.dimension_semantics<parallel>], iteration_bounds = array<i64: 2, 4>, scalar_prefetch = 0 : i64, scratch_operands = 2 : i64, tpu.core_type = #tpu.core_type<tc>, window_params = [{transform_indices = @transform_0, window_bounds = array<i64: 1, 1, 64, 8>}, {transform_indices = @transform_1, window_bounds = array<i64: 1, 1, 64, 8>}, {transform_indices = @transform_2, window_bounds = array<i64: 1, 1, 64, 8>}, {pipeline_mode = #tpu.pipeline_mode<synchronous>, transform_indices = @transform_3, window_bounds = array<i64: 3, 8, 8>}, {pipeline_mode = #tpu.pipeline_mode<synchronous>, transform_indices = @transform_4, window_bounds = array<i64: 3, 3, 8, 8>}, {pipeline_mode = #tpu.pipeline_mode<synchronous>, transform_indices = @transform_5, window_bounds = array<i64: 8, 16>}, {pipeline_mode = #tpu.pipeline_mode<synchronous>, transform_indices = @transform_6, window_bounds = array<i64: 1, 8>}, {pipeline_mode = #tpu.pipeline_mode<synchronous>, transform_indices = @transform_7, window_bounds = array<i64: 1, 8>}, {pipeline_mode = #tpu.pipeline_mode<synchronous>, transform_indices = @transform_8, window_bounds = array<i64: 1, 16>}, {transform_indices = @transform_9, window_bounds = array<i64: 1, 1, 64, 16>}]} {
    %cst = arith.constant 0.000000e+00 : f32
    %0 = vector.broadcast %cst : f32 to vector<64x8xf32>
    %c0 = arith.constant 0 : index
    %c0_0 = arith.constant 0 : index
    %1 = vector.load %arg12[%c0, %c0_0] : memref<64x8xf32, #tpu.memory_space<vmem>>, vector<64x8xf32>
    tpu.vector_store %arg12[%c0, %c0_0], %0 {strides = array<i32>} : memref<64x8xf32, #tpu.memory_space<vmem>>, vector<64x8xf32>,
    %c-1_i32 = arith.constant -1 : i32
    %2 = arith.addi %arg1, %c-1_i32 : i32
    %c0_i32 = arith.constant 0 : i32
    %3 = arith.cmpi sge, %2, %c0_i32 : i32
    %4 = arith.extui %3 : i1 to i32
    %c0_i32_1 = arith.constant 0 : i32
    %5 = arith.cmpi ne, %4, %c0_i32_1 : i32
    scf.if %5 {
      %c0_119 = arith.constant 0 : index
      %c0_120 = arith.constant 0 : index
      %102 = vector.load %arg12[%c0_119, %c0_120] : memref<64x8xf32, #tpu.memory_space<vmem>>, vector<64x8xf32>
      %c0_121 = arith.constant 0 : index
      %c0_122 = arith.constant 0 : index
      %c0_123 = arith.constant 0 : index
      %c0_124 = arith.constant 0 : index
      %103 = vector.load %arg2[%c0_121, %c0_122, %c0_123, %c0_124] : memref<1x1x64x8xbf16, #tpu.memory_space<vmem>>, vector<1x1x64x8xbf16>
      %104 = vector.shape_cast %103 : vector<1x1x64x8xbf16> to vector<64x8xbf16>
      %c0_125 = arith.constant 0 : index
      %c0_126 = arith.constant 0 : index
      %c0_127 = arith.constant 0 : index
      %105 = vector.load %arg5[%c0_125, %c0_126, %c0_127] : memref<3x8x8xbf16, #tpu.memory_space<vmem>>, vector<1x8x8xbf16>
      %106 = vector.shape_cast %105 : vector<1x8x8xbf16> to vector<8x8xbf16>
      %cst_128 = arith.constant dense<0.000000e+00> : vector<64x8xf32>
      %107 = tpu.matmul %104, %106, %cst_128 {dimension_numbers = #tpu.dot_dimension_numbers<[1], [0], [0], [1], [0, 0, 1, 1], [], []>} : vector<64x8xbf16>, vector<8x8xbf16>, vector<64x8xf32> -> vector<64x8xf32>
      %108 = arith.addf %102, %107 : vector<64x8xf32>
      %c0_129 = arith.constant 0 : index
      %c0_130 = arith.constant 0 : index
      %109 = vector.load %arg12[%c0_129, %c0_130] : memref<64x8xf32, #tpu.memory_space<vmem>>, vector<64x8xf32>
      tpu.vector_store %arg12[%c0_129, %c0_130], %108 {strides = array<i32>} : memref<64x8xf32, #tpu.memory_space<vmem>>, vector<64x8xf32>,
    } else {
    }
    %c0_2 = arith.constant 0 : index
    %c0_3 = arith.constant 0 : index
    %6 = vector.load %arg12[%c0_2, %c0_3] : memref<64x8xf32, #tpu.memory_space<vmem>>, vector<64x8xf32>
    %c0_4 = arith.constant 0 : index
    %c0_5 = arith.constant 0 : index
    %c0_6 = arith.constant 0 : index
    %c0_7 = arith.constant 0 : index
    %7 = vector.load %arg3[%c0_4, %c0_5, %c0_6, %c0_7] : memref<1x1x64x8xbf16, #tpu.memory_space<vmem>>, vector<1x1x64x8xbf16>
    %8 = vector.shape_cast %7 : vector<1x1x64x8xbf16> to vector<64x8xbf16>
    %c1 = arith.constant 1 : index
    %c0_8 = arith.constant 0 : index
    %c0_9 = arith.constant 0 : index
    %9 = vector.load %arg5[%c1, %c0_8, %c0_9] : memref<3x8x8xbf16, #tpu.memory_space<vmem>>, vector<1x8x8xbf16>
    %10 = vector.shape_cast %9 : vector<1x8x8xbf16> to vector<8x8xbf16>
    %cst_10 = arith.constant dense<0.000000e+00> : vector<64x8xf32>
    %11 = tpu.matmul %8, %10, %cst_10 {dimension_numbers = #tpu.dot_dimension_numbers<[1], [0], [0], [1], [0, 0, 1, 1], [], []>} : vector<64x8xbf16>, vector<8x8xbf16>, vector<64x8xf32> -> vector<64x8xf32>
    %12 = arith.addf %6, %11 : vector<64x8xf32>
    %c0_11 = arith.constant 0 : index
    %c0_12 = arith.constant 0 : index
    %13 = vector.load %arg12[%c0_11, %c0_12] : memref<64x8xf32, #tpu.memory_space<vmem>>, vector<64x8xf32>
    tpu.vector_store %arg12[%c0_11, %c0_12], %12 {strides = array<i32>} : memref<64x8xf32, #tpu.memory_space<vmem>>, vector<64x8xf32>,
    %c1_i32 = arith.constant 1 : i32
    %14 = arith.addi %arg1, %c1_i32 : i32
    %c3_i32 = arith.constant 3 : i32
    %15 = arith.cmpi sle, %14, %c3_i32 : i32
    %16 = arith.extui %15 : i1 to i32
    %c0_i32_13 = arith.constant 0 : i32
    %17 = arith.cmpi ne, %16, %c0_i32_13 : i32
    scf.if %17 {
      %c0_119 = arith.constant 0 : index
      %c0_120 = arith.constant 0 : index
      %102 = vector.load %arg12[%c0_119, %c0_120] : memref<64x8xf32, #tpu.memory_space<vmem>>, vector<64x8xf32>
      %c0_121 = arith.constant 0 : index
      %c0_122 = arith.constant 0 : index
      %c0_123 = arith.constant 0 : index
      %c0_124 = arith.constant 0 : index
      %103 = vector.load %arg4[%c0_121, %c0_122, %c0_123, %c0_124] : memref<1x1x64x8xbf16, #tpu.memory_space<vmem>>, vector<1x1x64x8xbf16>
      %104 = vector.shape_cast %103 : vector<1x1x64x8xbf16> to vector<64x8xbf16>
      %c2_125 = arith.constant 2 : index
      %c0_126 = arith.constant 0 : index
      %c0_127 = arith.constant 0 : index
      %105 = vector.load %arg5[%c2_125, %c0_126, %c0_127] : memref<3x8x8xbf16, #tpu.memory_space<vmem>>, vector<1x8x8xbf16>
      %106 = vector.shape_cast %105 : vector<1x8x8xbf16> to vector<8x8xbf16>
      %cst_128 = arith.constant dense<0.000000e+00> : vector<64x8xf32>
      %107 = tpu.matmul %104, %106, %cst_128 {dimension_numbers = #tpu.dot_dimension_numbers<[1], [0], [0], [1], [0, 0, 1, 1], [], []>} : vector<64x8xbf16>, vector<8x8xbf16>, vector<64x8xf32> -> vector<64x8xf32>
      %108 = arith.addf %102, %107 : vector<64x8xf32>
      %c0_129 = arith.constant 0 : index
      %c0_130 = arith.constant 0 : index
      %109 = vector.load %arg12[%c0_129, %c0_130] : memref<64x8xf32, #tpu.memory_space<vmem>>, vector<64x8xf32>
      tpu.vector_store %arg12[%c0_129, %c0_130], %108 {strides = array<i32>} : memref<64x8xf32, #tpu.memory_space<vmem>>, vector<64x8xf32>,
    } else {
    }
    %c0_14 = arith.constant 0 : index
    %c0_15 = arith.constant 0 : index
    %18 = vector.load %arg12[%c0_14, %c0_15] : memref<64x8xf32, #tpu.memory_space<vmem>>, vector<64x8xf32>
    %c0_16 = arith.constant 0 : index
    %c0_17 = arith.constant 0 : index
    %19 = vector.load %arg8[%c0_16, %c0_17] : memref<1x8xf32, #tpu.memory_space<vmem>>, vector<1x8xf32>
    %20 = vector.broadcast %19 : vector<1x8xf32> to vector<64x8xf32>
    %21 = arith.addf %18, %20 : vector<64x8xf32>
    %cst_18 = arith.constant 0.000000e+00 : f32
    %22 = vector.broadcast %cst_18 : f32 to vector<64x8xf32>
    %23 = arith.maximumf %21, %22 : vector<64x8xf32>
    %cst_19 = arith.constant 0.000000e+00 : bf16
    %24 = vector.broadcast %cst_19 : bf16 to vector<1x10x8xbf16>
    %cst_20 = arith.constant 0.000000e+00 : bf16
    %25 = vector.broadcast %cst_20 : bf16 to vector<10x1x8xbf16>
    %c0_21 = arith.constant 0 : index
    %c0_22 = arith.constant 0 : index
    %c0_23 = arith.constant 0 : index
    %26 = vector.load %arg13[%c0_21, %c0_22, %c0_23] : memref<10x10x8xbf16, #tpu.memory_space<vmem>>, vector<1x10x8xbf16>
    tpu.vector_store %arg13[%c0_21, %c0_22, %c0_23], %24 {strides = array<i32>} : memref<10x10x8xbf16, #tpu.memory_space<vmem>>, vector<1x10x8xbf16>,
    %c9 = arith.constant 9 : index
    %c0_24 = arith.constant 0 : index
    %c0_25 = arith.constant 0 : index
    %27 = vector.load %arg13[%c9, %c0_24, %c0_25] : memref<10x10x8xbf16, #tpu.memory_space<vmem>>, vector<1x10x8xbf16>
    tpu.vector_store %arg13[%c9, %c0_24, %c0_25], %24 {strides = array<i32>} : memref<10x10x8xbf16, #tpu.memory_space<vmem>>, vector<1x10x8xbf16>,
    %c0_26 = arith.constant 0 : index
    %c0_27 = arith.constant 0 : index
    %c0_28 = arith.constant 0 : index
    %28 = vector.load %arg13[%c0_26, %c0_27, %c0_28] : memref<10x10x8xbf16, #tpu.memory_space<vmem>>, vector<10x1x8xbf16>
    tpu.vector_store %arg13[%c0_26, %c0_27, %c0_28], %25 {strides = array<i32>} : memref<10x10x8xbf16, #tpu.memory_space<vmem>>, vector<10x1x8xbf16>,
    %c0_29 = arith.constant 0 : index
    %c9_30 = arith.constant 9 : index
    %c0_31 = arith.constant 0 : index
    %29 = vector.load %arg13[%c0_29, %c9_30, %c0_31] : memref<10x10x8xbf16, #tpu.memory_space<vmem>>, vector<10x1x8xbf16>
    tpu.vector_store %arg13[%c0_29, %c9_30, %c0_31], %25 {strides = array<i32>} : memref<10x10x8xbf16, #tpu.memory_space<vmem>>, vector<10x1x8xbf16>,
    %30 = arith.truncf %23 : vector<64x8xf32> to vector<64x8xbf16>
    %31 = vector.shape_cast %30 : vector<64x8xbf16> to vector<8x8x8xbf16>
    %c1_32 = arith.constant 1 : index
    %c1_33 = arith.constant 1 : index
    %c0_34 = arith.constant 0 : index
    %32 = vector.load %arg13[%c1_32, %c1_33, %c0_34] : memref<10x10x8xbf16, #tpu.memory_space<vmem>>, vector<8x8x8xbf16>
    tpu.vector_store %arg13[%c1_32, %c1_33, %c0_34], %31 {strides = array<i32>} : memref<10x10x8xbf16, #tpu.memory_space<vmem>>, vector<8x8x8xbf16>,
    %cst_35 = arith.constant 0.000000e+00 : f32
    %33 = vector.broadcast %cst_35 : f32 to vector<64x8xf32>
    %c0_36 = arith.constant 0 : index
    %c0_37 = arith.constant 0 : index
    %c0_38 = arith.constant 0 : index
    %34 = vector.load %arg13[%c0_36, %c0_37, %c0_38] : memref<10x10x8xbf16, #tpu.memory_space<vmem>>, vector<8x8x8xbf16>
    %35 = vector.shape_cast %34 : vector<8x8x8xbf16> to vector<64x8xbf16>
    %c0_39 = arith.constant 0 : index
    %c0_40 = arith.constant 0 : index
    %c0_41 = arith.constant 0 : index
    %c0_42 = arith.constant 0 : index
    %36 = vector.load %arg6[%c0_39, %c0_40, %c0_41, %c0_42] : memref<3x3x8x8xbf16, #tpu.memory_space<vmem>>, vector<1x1x8x8xbf16>
    %37 = vector.shape_cast %36 : vector<1x1x8x8xbf16> to vector<8x8xbf16>
    %cst_43 = arith.constant dense<0.000000e+00> : vector<64x8xf32>
    %38 = tpu.matmul %35, %37, %cst_43 {dimension_numbers = #tpu.dot_dimension_numbers<[1], [0], [0], [1], [0, 0, 1, 1], [], []>} : vector<64x8xbf16>, vector<8x8xbf16>, vector<64x8xf32> -> vector<64x8xf32>
    %39 = arith.addf %33, %38 : vector<64x8xf32>
    %c0_44 = arith.constant 0 : index
    %c1_45 = arith.constant 1 : index
    %c0_46 = arith.constant 0 : index
    %40 = vector.load %arg13[%c0_44, %c1_45, %c0_46] : memref<10x10x8xbf16, #tpu.memory_space<vmem>>, vector<8x8x8xbf16>
    %41 = vector.shape_cast %40 : vector<8x8x8xbf16> to vector<64x8xbf16>
    %c0_47 = arith.constant 0 : index
    %c1_48 = arith.constant 1 : index
    %c0_49 = arith.constant 0 : index
    %c0_50 = arith.constant 0 : index
    %42 = vector.load %arg6[%c0_47, %c1_48, %c0_49, %c0_50] : memref<3x3x8x8xbf16, #tpu.memory_space<vmem>>, vector<1x1x8x8xbf16>
    %43 = vector.shape_cast %42 : vector<1x1x8x8xbf16> to vector<8x8xbf16>
    %cst_51 = arith.constant dense<0.000000e+00> : vector<64x8xf32>
    %44 = tpu.matmul %41, %43, %cst_51 {dimension_numbers = #tpu.dot_dimension_numbers<[1], [0], [0], [1], [0, 0, 1, 1], [], []>} : vector<64x8xbf16>, vector<8x8xbf16>, vector<64x8xf32> -> vector<64x8xf32>
    %45 = arith.addf %39, %44 : vector<64x8xf32>
    %c0_52 = arith.constant 0 : index
    %c2 = arith.constant 2 : index
    %c0_53 = arith.constant 0 : index
    %46 = vector.load %arg13[%c0_52, %c2, %c0_53] : memref<10x10x8xbf16, #tpu.memory_space<vmem>>, vector<8x8x8xbf16>
    %47 = vector.shape_cast %46 : vector<8x8x8xbf16> to vector<64x8xbf16>
    %c0_54 = arith.constant 0 : index
    %c2_55 = arith.constant 2 : index
    %c0_56 = arith.constant 0 : index
    %c0_57 = arith.constant 0 : index
    %48 = vector.load %arg6[%c0_54, %c2_55, %c0_56, %c0_57] : memref<3x3x8x8xbf16, #tpu.memory_space<vmem>>, vector<1x1x8x8xbf16>
    %49 = vector.shape_cast %48 : vector<1x1x8x8xbf16> to vector<8x8xbf16>
    %cst_58 = arith.constant dense<0.000000e+00> : vector<64x8xf32>
    %50 = tpu.matmul %47, %49, %cst_58 {dimension_numbers = #tpu.dot_dimension_numbers<[1], [0], [0], [1], [0, 0, 1, 1], [], []>} : vector<64x8xbf16>, vector<8x8xbf16>, vector<64x8xf32> -> vector<64x8xf32>
    %51 = arith.addf %45, %50 : vector<64x8xf32>
    %c1_59 = arith.constant 1 : index
    %c0_60 = arith.constant 0 : index
    %c0_61 = arith.constant 0 : index
    %52 = vector.load %arg13[%c1_59, %c0_60, %c0_61] : memref<10x10x8xbf16, #tpu.memory_space<vmem>>, vector<8x8x8xbf16>
    %53 = vector.shape_cast %52 : vector<8x8x8xbf16> to vector<64x8xbf16>
    %c1_62 = arith.constant 1 : index
    %c0_63 = arith.constant 0 : index
    %c0_64 = arith.constant 0 : index
    %c0_65 = arith.constant 0 : index
    %54 = vector.load %arg6[%c1_62, %c0_63, %c0_64, %c0_65] : memref<3x3x8x8xbf16, #tpu.memory_space<vmem>>, vector<1x1x8x8xbf16>
    %55 = vector.shape_cast %54 : vector<1x1x8x8xbf16> to vector<8x8xbf16>
    %cst_66 = arith.constant dense<0.000000e+00> : vector<64x8xf32>
    %56 = tpu.matmul %53, %55, %cst_66 {dimension_numbers = #tpu.dot_dimension_numbers<[1], [0], [0], [1], [0, 0, 1, 1], [], []>} : vector<64x8xbf16>, vector<8x8xbf16>, vector<64x8xf32> -> vector<64x8xf32>
    %57 = arith.addf %51, %56 : vector<64x8xf32>
    %c1_67 = arith.constant 1 : index
    %c1_68 = arith.constant 1 : index
    %c0_69 = arith.constant 0 : index
    %58 = vector.load %arg13[%c1_67, %c1_68, %c0_69] : memref<10x10x8xbf16, #tpu.memory_space<vmem>>, vector<8x8x8xbf16>
    %59 = vector.shape_cast %58 : vector<8x8x8xbf16> to vector<64x8xbf16>
    %c1_70 = arith.constant 1 : index
    %c1_71 = arith.constant 1 : index
    %c0_72 = arith.constant 0 : index
    %c0_73 = arith.constant 0 : index
    %60 = vector.load %arg6[%c1_70, %c1_71, %c0_72, %c0_73] : memref<3x3x8x8xbf16, #tpu.memory_space<vmem>>, vector<1x1x8x8xbf16>
    %61 = vector.shape_cast %60 : vector<1x1x8x8xbf16> to vector<8x8xbf16>
    %cst_74 = arith.constant dense<0.000000e+00> : vector<64x8xf32>
    %62 = tpu.matmul %59, %61, %cst_74 {dimension_numbers = #tpu.dot_dimension_numbers<[1], [0], [0], [1], [0, 0, 1, 1], [], []>} : vector<64x8xbf16>, vector<8x8xbf16>, vector<64x8xf32> -> vector<64x8xf32>
    %63 = arith.addf %57, %62 : vector<64x8xf32>
    %c1_75 = arith.constant 1 : index
    %c2_76 = arith.constant 2 : index
    %c0_77 = arith.constant 0 : index
    %64 = vector.load %arg13[%c1_75, %c2_76, %c0_77] : memref<10x10x8xbf16, #tpu.memory_space<vmem>>, vector<8x8x8xbf16>
    %65 = vector.shape_cast %64 : vector<8x8x8xbf16> to vector<64x8xbf16>
    %c1_78 = arith.constant 1 : index
    %c2_79 = arith.constant 2 : index
    %c0_80 = arith.constant 0 : index
    %c0_81 = arith.constant 0 : index
    %66 = vector.load %arg6[%c1_78, %c2_79, %c0_80, %c0_81] : memref<3x3x8x8xbf16, #tpu.memory_space<vmem>>, vector<1x1x8x8xbf16>
    %67 = vector.shape_cast %66 : vector<1x1x8x8xbf16> to vector<8x8xbf16>
    %cst_82 = arith.constant dense<0.000000e+00> : vector<64x8xf32>
    %68 = tpu.matmul %65, %67, %cst_82 {dimension_numbers = #tpu.dot_dimension_numbers<[1], [0], [0], [1], [0, 0, 1, 1], [], []>} : vector<64x8xbf16>, vector<8x8xbf16>, vector<64x8xf32> -> vector<64x8xf32>
    %69 = arith.addf %63, %68 : vector<64x8xf32>
    %c2_83 = arith.constant 2 : index
    %c0_84 = arith.constant 0 : index
    %c0_85 = arith.constant 0 : index
    %70 = vector.load %arg13[%c2_83, %c0_84, %c0_85] : memref<10x10x8xbf16, #tpu.memory_space<vmem>>, vector<8x8x8xbf16>
    %71 = vector.shape_cast %70 : vector<8x8x8xbf16> to vector<64x8xbf16>
    %c2_86 = arith.constant 2 : index
    %c0_87 = arith.constant 0 : index
    %c0_88 = arith.constant 0 : index
    %c0_89 = arith.constant 0 : index
    %72 = vector.load %arg6[%c2_86, %c0_87, %c0_88, %c0_89] : memref<3x3x8x8xbf16, #tpu.memory_space<vmem>>, vector<1x1x8x8xbf16>
    %73 = vector.shape_cast %72 : vector<1x1x8x8xbf16> to vector<8x8xbf16>
    %cst_90 = arith.constant dense<0.000000e+00> : vector<64x8xf32>
    %74 = tpu.matmul %71, %73, %cst_90 {dimension_numbers = #tpu.dot_dimension_numbers<[1], [0], [0], [1], [0, 0, 1, 1], [], []>} : vector<64x8xbf16>, vector<8x8xbf16>, vector<64x8xf32> -> vector<64x8xf32>
    %75 = arith.addf %69, %74 : vector<64x8xf32>
    %c2_91 = arith.constant 2 : index
    %c1_92 = arith.constant 1 : index
    %c0_93 = arith.constant 0 : index
    %76 = vector.load %arg13[%c2_91, %c1_92, %c0_93] : memref<10x10x8xbf16, #tpu.memory_space<vmem>>, vector<8x8x8xbf16>
    %77 = vector.shape_cast %76 : vector<8x8x8xbf16> to vector<64x8xbf16>
    %c2_94 = arith.constant 2 : index
    %c1_95 = arith.constant 1 : index
    %c0_96 = arith.constant 0 : index
    %c0_97 = arith.constant 0 : index
    %78 = vector.load %arg6[%c2_94, %c1_95, %c0_96, %c0_97] : memref<3x3x8x8xbf16, #tpu.memory_space<vmem>>, vector<1x1x8x8xbf16>
    %79 = vector.shape_cast %78 : vector<1x1x8x8xbf16> to vector<8x8xbf16>
    %cst_98 = arith.constant dense<0.000000e+00> : vector<64x8xf32>
    %80 = tpu.matmul %77, %79, %cst_98 {dimension_numbers = #tpu.dot_dimension_numbers<[1], [0], [0], [1], [0, 0, 1, 1], [], []>} : vector<64x8xbf16>, vector<8x8xbf16>, vector<64x8xf32> -> vector<64x8xf32>
    %81 = arith.addf %75, %80 : vector<64x8xf32>
    %c2_99 = arith.constant 2 : index
    %c2_100 = arith.constant 2 : index
    %c0_101 = arith.constant 0 : index
    %82 = vector.load %arg13[%c2_99, %c2_100, %c0_101] : memref<10x10x8xbf16, #tpu.memory_space<vmem>>, vector<8x8x8xbf16>
    %83 = vector.shape_cast %82 : vector<8x8x8xbf16> to vector<64x8xbf16>
    %c2_102 = arith.constant 2 : index
    %c2_103 = arith.constant 2 : index
    %c0_104 = arith.constant 0 : index
    %c0_105 = arith.constant 0 : index
    %84 = vector.load %arg6[%c2_102, %c2_103, %c0_104, %c0_105] : memref<3x3x8x8xbf16, #tpu.memory_space<vmem>>, vector<1x1x8x8xbf16>
    %85 = vector.shape_cast %84 : vector<1x1x8x8xbf16> to vector<8x8xbf16>
    %cst_106 = arith.constant dense<0.000000e+00> : vector<64x8xf32>
    %86 = tpu.matmul %83, %85, %cst_106 {dimension_numbers = #tpu.dot_dimension_numbers<[1], [0], [0], [1], [0, 0, 1, 1], [], []>} : vector<64x8xbf16>, vector<8x8xbf16>, vector<64x8xf32> -> vector<64x8xf32>
    %87 = arith.addf %81, %86 : vector<64x8xf32>
    %c0_107 = arith.constant 0 : index
    %c0_108 = arith.constant 0 : index
    %88 = vector.load %arg9[%c0_107, %c0_108] : memref<1x8xf32, #tpu.memory_space<vmem>>, vector<1x8xf32>
    %89 = vector.broadcast %88 : vector<1x8xf32> to vector<64x8xf32>
    %90 = arith.addf %87, %89 : vector<64x8xf32>
    %cst_109 = arith.constant 0.000000e+00 : f32
    %91 = vector.broadcast %cst_109 : f32 to vector<64x8xf32>
    %92 = arith.maximumf %90, %91 : vector<64x8xf32>
    %93 = arith.truncf %92 : vector<64x8xf32> to vector<64x8xbf16>
    %c0_110 = arith.constant 0 : index
    %c0_111 = arith.constant 0 : index
    %94 = vector.load %arg7[%c0_110, %c0_111] : memref<8x16xbf16, #tpu.memory_space<vmem>>, vector<8x16xbf16>
    %cst_112 = arith.constant dense<0.000000e+00> : vector<64x16xf32>
    %95 = tpu.matmul %93, %94, %cst_112 {dimension_numbers = #tpu.dot_dimension_numbers<[1], [0], [0], [1], [0, 0, 1, 1], [], []>} : vector<64x8xbf16>, vector<8x16xbf16>, vector<64x16xf32> -> vector<64x16xf32>
    %c0_113 = arith.constant 0 : index
    %c0_114 = arith.constant 0 : index
    %96 = vector.load %arg10[%c0_113, %c0_114] : memref<1x16xf32, #tpu.memory_space<vmem>>, vector<1x16xf32>
    %97 = vector.broadcast %96 : vector<1x16xf32> to vector<64x16xf32>
    %98 = arith.addf %95, %97 : vector<64x16xf32>
    %c0_115 = arith.constant 0 : index
    %c0_116 = arith.constant 0 : index
    %c0_117 = arith.constant 0 : index
    %c0_118 = arith.constant 0 : index
    %99 = vector.load %arg11[%c0_115, %c0_116, %c0_117, %c0_118] : memref<1x1x64x16xf32, #tpu.memory_space<vmem>>, vector<1x1x64x16xf32>
    %100 = vector.shape_cast %99 : vector<1x1x64x16xf32> to vector<64x16xf32>
    %101 = vector.shape_cast %98 : vector<64x16xf32> to vector<1x1x64x16xf32>
    tpu.vector_store %arg11[%c0_115, %c0_116, %c0_117, %c0_118], %101 {strides = array<i32>} : memref<1x1x64x16xf32, #tpu.memory_space<vmem>>, vector<1x1x64x16xf32>,
    return
  }
  func.func @transform_0(%arg0: i32, %arg1: i32) -> (i32, i32, i32, i32) {
    %c-1_i32 = arith.constant -1 : i32
    %0 = arith.addi %arg1, %c-1_i32 : i32
    %c0_i32 = arith.constant 0 : i32
    %1 = arith.maxsi %0, %c0_i32 : i32
    %c3_i32 = arith.constant 3 : i32
    %2 = arith.minsi %1, %c3_i32 : i32
    %c0_i32_0 = arith.constant 0 : i32
    %c0_i32_1 = arith.constant 0 : i32
    %c0_i32_2 = arith.constant 0 : i32
    return %arg0, %2, %c0_i32_0, %c0_i32_1 : i32, i32, i32, i32
  }
  func.func @transform_1(%arg0: i32, %arg1: i32) -> (i32, i32, i32, i32) {
    %c0_i32 = arith.constant 0 : i32
    %0 = arith.addi %arg1, %c0_i32 : i32
    %c0_i32_0 = arith.constant 0 : i32
    %1 = arith.maxsi %0, %c0_i32_0 : i32
    %c3_i32 = arith.constant 3 : i32
    %2 = arith.minsi %1, %c3_i32 : i32
    %c0_i32_1 = arith.constant 0 : i32
    %c0_i32_2 = arith.constant 0 : i32
    %c0_i32_3 = arith.constant 0 : i32
    return %arg0, %2, %c0_i32_1, %c0_i32_2 : i32, i32, i32, i32
  }
  func.func @transform_2(%arg0: i32, %arg1: i32) -> (i32, i32, i32, i32) {
    %c1_i32 = arith.constant 1 : i32
    %0 = arith.addi %arg1, %c1_i32 : i32
    %c0_i32 = arith.constant 0 : i32
    %1 = arith.maxsi %0, %c0_i32 : i32
    %c3_i32 = arith.constant 3 : i32
    %2 = arith.minsi %1, %c3_i32 : i32
    %c0_i32_0 = arith.constant 0 : i32
    %c0_i32_1 = arith.constant 0 : i32
    %c0_i32_2 = arith.constant 0 : i32
    return %arg0, %2, %c0_i32_0, %c0_i32_1 : i32, i32, i32, i32
  }
  func.func @transform_3(%arg0: i32, %arg1: i32) -> (i32, i32, i32) {
    %c0_i32 = arith.constant 0 : i32
    %c0_i32_0 = arith.constant 0 : i32
    %c0_i32_1 = arith.constant 0 : i32
    %c0_i32_2 = arith.constant 0 : i32
    return %c0_i32, %c0_i32_0, %c0_i32_1 : i32, i32, i32
  }
  func.func @transform_4(%arg0: i32, %arg1: i32) -> (i32, i32, i32, i32) {
    %c0_i32 = arith.constant 0 : i32
    %c0_i32_0 = arith.constant 0 : i32
    %c0_i32_1 = arith.constant 0 : i32
    %c0_i32_2 = arith.constant 0 : i32
    %c0_i32_3 = arith.constant 0 : i32
    return %c0_i32, %c0_i32_0, %c0_i32_1, %c0_i32_2 : i32, i32, i32, i32
  }
  func.func @transform_5(%arg0: i32, %arg1: i32) -> (i32, i32) {
    %c0_i32 = arith.constant 0 : i32
    %c0_i32_0 = arith.constant 0 : i32
    %c0_i32_1 = arith.constant 0 : i32
    return %c0_i32, %c0_i32_0 : i32, i32
  }
  func.func @transform_6(%arg0: i32, %arg1: i32) -> (i32, i32) {
    %c0_i32 = arith.constant 0 : i32
    %c0_i32_0 = arith.constant 0 : i32
    %c0_i32_1 = arith.constant 0 : i32
    return %c0_i32, %c0_i32_0 : i32, i32
  }
  func.func @transform_7(%arg0: i32, %arg1: i32) -> (i32, i32) {
    %c0_i32 = arith.constant 0 : i32
    %c0_i32_0 = arith.constant 0 : i32
    %c0_i32_1 = arith.constant 0 : i32
    return %c0_i32, %c0_i32_0 : i32, i32
  }
  func.func @transform_8(%arg0: i32, %arg1: i32) -> (i32, i32) {
    %c0_i32 = arith.constant 0 : i32
    %c0_i32_0 = arith.constant 0 : i32
    %c0_i32_1 = arith.constant 0 : i32
    return %c0_i32, %c0_i32_0 : i32, i32
  }
  func.func @transform_9(%arg0: i32, %arg1: i32) -> (i32, i32, i32, i32) {
    %c0_i32 = arith.constant 0 : i32
    %c0_i32_0 = arith.constant 0 : i32
    %c0_i32_1 = arith.constant 0 : i32
    return %arg0, %arg1, %c0_i32, %c0_i32_0 : i32, i32, i32, i32
  }
}

</mosaic_0001>

<bundles_post_ra>
// kernel: tpu_custom_call.1
= control target key start
LH: loop header
LB: loop body
LE: loop exit
PB: predicated region body
PF: predicated region fallthrough
CT: control target
= control target key end

     0   :  { %s2922_s30 = smov 0   ;;  %s2924_s10 = smov 0   ;;  %s3523_s0 = inlined_call_operand.vmem [shape: bf16[2,4,64,8], index: 0, kind: input, shape index: {}]   ;;  %s3524_s1 = inlined_call_operand.vmem [shape: bf16[2,4,64,8], index: 1, kind: input, shape index: {}]   ;;  %s3525_s2 = inlined_call_operand.vmem [shape: bf16[2,4,64,8], index: 2, kind: input, shape index: {}]   ;;  %s3526_s3 = inlined_call_operand.vmem [shape: bf16[3,8,8], index: 3, kind: input, shape index: {}]   ;;  %s3527_s4 = inlined_call_operand.vmem [shape: bf16[3,3,8,8], index: 4, kind: input, shape index: {}]   ;;  %s3528_s5 = inlined_call_operand.vmem [shape: bf16[8,16], index: 5, kind: input, shape index: {}]   ;;  %s3529_s6 = inlined_call_operand.vmem [shape: f32[1,8], index: 6, kind: input, shape index: {}]   ;;  %s3530_s7 = inlined_call_operand.vmem [shape: f32[1,8], index: 7, kind: input, shape index: {}]   ;;  %s3531_s8 = inlined_call_operand.vmem [shape: f32[1,16], index: 8, kind: input, shape index: {}]   ;;  %s3532_s9 = inlined_call_operand.vmem [shape: f32[2,4,64,16], index: 9, kind: output, shape index: {}]  }
   0x1   :  { %3534 = sst [smem:[#allocation7_spill]] %s3523_s0  ;;  %s2926_s11 = smov 0  }
   0x2   :  { %s2928_s12 = smov 0   ;;  %s2930_s13 = smov 0  }
   0x3 LB: > { %3535 = sst [smem:[#allocation4_spill]] %s2864_s12  ;;  %s28_s14 = sadd.s32 1, %s2860_s11  ;;  %s2868_s13 = sphi %s2930_s13, %s19_s13   ;;  %s2864_s12 = sphi %s2928_s12, %s3551_s12   ;;  %s2860_s11 = sphi %s2926_s11, %s3553_s11   ;;  %s2856_s10 = sphi %s2924_s10, %s3549_s10   ;;  %s2852_s30 = sphi %s2922_s30, %s3552_s30  }
   0x4   : > { %s31_s15 = sadd.s32 1, %s2864_s12  ;;  %p29_p0 = scmp.ge.s32.totalorder %s28_s14, 4 }
   0x5   : > { %p2518_p1 = scmp.ge.s32.totalorder %s2868_s13, 1  ;;  %p395_p2 = scmp.lt.s32.totalorder %s2868_s13, 9 }
   0x6   : > { %s3555_s14 = smov (%p29_p0, %s28_s14), 0  ;;  %s3557_s15 = smov (!%p29_p0, %s31_s15), %s2864_s12 }
   0x7   : > { %3536 = sst [smem:[#allocation5_spill]] %s3555_s14  ;;  %p396_p3 = pnand %p2518_p1, %p395_p2 }
   0x8   : > { %p33_p4 = scmp.ge.s32.totalorder %s3557_s15, 2  ;;  %s2955_s16 = sadd.s32 (!%p396_p3), 4294967295, %s2852_s30 }
   0x9   : > { %399 = sbr.rel (%p396_p3) target bundleno = 966 (0x3c6), region = 56  ;;  %p476_p5 = scmp.lt.s32.totalorder (!%p396_p3), %s2856_s10, 1 }
   0xa   : > { %s3559_s15 = smov (%p33_p4, %s3557_s15), 0  ;;  %p472_p6 = scmp.gt.s32.totalorder (!%p396_p3), %s2955_s16, 0 }
   0xb   : > { %3537 = sst [smem:[#allocation6_spill]] %s3559_s15  ;;  %p2519_p7 = scmp.lt.s32.totalorder (!%p396_p3), %s2955_s16, 3 }
   0xc   : > { %p490_p8 = scmp.gt.s32.totalorder (!%p396_p3), %s2852_s30, 0  ;;  %p2527_p10 = scmp.lt.s32.totalorder (!%p396_p3), %s2852_s30, 3 }
   0xd   : > { %s2971_s20 = sadd.s32 (!%p396_p3), 1, %s2852_s30  ;;  %s3538_s0 = sld [smem:[#allocation7_spill]] (!%p396_p3) }
   0xe   : > { %vm536_vm0 = vcmask 64512   ;;  %v2870_v0 = vmov 0.0   ;;  %s3561_s10 = smov (!%p476_p5, %s2856_s10), 1  ;;  %p508_p11 = scmp.gt.s32.totalorder %s2971_s20, 0 }
   0xf   : > { %537 = vst.msk [vmem:[#allocation2] sm:$0xff] %vm536_vm0, %v2870_v0  ;;  %s473_s17 = scalar_select %p472_p6, %s2955_s16, 0 }
  0x10   : > { %538 = vst.msk [vmem:[#allocation2 + $0x8] sm:$0xff] %vm536_vm0, %v2870_v0  ;;  %s491_s18 = scalar_select %p490_p8, %s2852_s30, 0 }
  0x11   : > { %539 = vst.msk [vmem:[#allocation2 + $0x10] sm:$0xff] %vm536_vm0, %v2870_v0  ;;  %s3563_s17 = smov (!%p2519_p7, %s473_s17), 3  ;;  %s2525_s19 = sshll.u32 %s3561_s10, 5 }
  0x12   : > { %540 = vst.msk [vmem:[#allocation2 + $0x18] sm:$0xff] %vm536_vm0, %v2870_v0  ;;  %p478_p9 = scmp.lt.s32.totalorder %s3563_s17, 3  ;;  %s3567_s18 = smov (!%p2527_p10, %s491_s18), 3 }
  0x13   : > { %541 = vst.msk [vmem:[#allocation2 + $0x20] sm:$0xff] %vm536_vm0, %v2870_v0  ;;  %p496_p12 = scmp.lt.s32.totalorder %s3567_s18, 3  ;;  %p2535_p13 = scmp.lt.s32.totalorder %s2971_s20, 3 }
  0x14   : > { %542 = vst.msk [vmem:[#allocation2 + $0x28] sm:$0xff] %vm536_vm0, %v2870_v0  ;;  %s3565_s17 = smov (!%p478_p9, %s3563_s17), 3  ;;  %s3573_s30 = smov (!%p2527_p10, %s2852_s30), 3 }
  0x15   : > { %543 = vst.msk [vmem:[#allocation2 + $0x30] sm:$0xff] %vm536_vm0, %v2870_v0  ;;  %s2524_s21 = sshll.u32 %s3565_s17, 3  ;;  %s3569_s18 = smov (!%p496_p12, %s3567_s18), 3 }
  0x16   : > { %544 = vst.msk [vmem:[#allocation2 + $0x38] sm:$0xff] %vm536_vm0, %v2870_v0  ;;  %s482_s22 = sadd.s32 %s2525_s19, %s2524_s21  ;;  %s2532_s28 = sshll.u32 %s3569_s18, 3 }
  0x17   : > { %s2526_s23 = sshll.u32 %s482_s22, 2  ;;  %s500_s29 = sadd.s32 %s2532_s28, %s2525_s19 }
  0x18   : > { %s484_s26 = scalar_lea.vmem %s3538_s0, %s2526_s23  ;;  %s2534_s10 = sshll.u32 %s500_s29, 2 }
  0x19   : > { %s509_s27 = scalar_select %p508_p11, %s2971_s20, 0 }
  0x1a   : > { %s2985_s12 = scalar_lea.vmem %s3524_s1, %s2534_s10  ;;  %s2543_s17 = sshll.u32 %s3573_s30, 3 }
  0x1b   : > { %s3571_s27 = smov (!%p2535_p13, %s509_s27), 3  ;;  %s532_s21 = sadd.s32 %s2543_s17, %s2525_s19 }
  0x1c   : > { %p514_p0 = scmp.lt.s32.totalorder %s3571_s27, 3  ;;  %s2545_s23 = sshll.u32 %s532_s21, 3 }
  0x1d   : > { %s2993_s28 = scalar_lea.vmem %s3532_s9, %s2545_s23  ;;  %p2546_p1 = scmp.lt.s32.totalorder %s2955_s16, 0 }
  0x1e   : > { %s3575_s27 = smov (!%p514_p0, %s3571_s27), 3 }
  0x1f   : > { %s2540_s22 = sshll.u32 %s3575_s27, 3  ;;  %549 = sbr.rel (%p2546_p1) target bundleno = 186 (0xba), region = 60 }
  0x20   : > { %s518_s24 = sadd.s32 %s2540_s22, %s2525_s19 }
  0x21   : > { %s2542_s29 = sshll.u32 %s518_s24, 2 }
  0x22   : > { %s2998_s15 = scalar_lea.vmem %s3525_s2, %s2542_s29 }
  0x24   : > { %v566_v1 = vld [vmem:[%s3526_s3] sm:$0xf]  ;;  %vm599_vm1 = vcmask 1043456   ;;  %v2751_v4 = vld [vmem:[%s484_s26 + $0x8] sm:$0xff]  ;;  %v2752_v5 = vld [vmem:[%s484_s26 + $0x10] sm:$0xff] }
  0x25   : > { %v601_v2 = vsel %vm599_vm1, %v566_v1, 0  ;;  %v2750_v3 = vld [vmem:[%s484_s26] sm:$0xff]  ;;  %v2753_v6 = vld [vmem:[%s484_s26 + $0x18] sm:$0xff]  ;;  %v552_v8 = vld [vmem:[#allocation2 + $0x10] sm:$0xff] }
  0x26   : > { %610 = vmatpush.bf16.msra.mxu0 %v601_v2  ;;  %2774 = vmatpush.bf16.msra.mxu1 %v601_v2  ;;  %v550_v7 = vld [vmem:[#allocation2] sm:$0xff]  ;;  %v556_v14 = vld [vmem:[#allocation2 + $0x30] sm:$0xff]  ;;  %v551_v15 = vld [vmem:[#allocation2 + $0x8] sm:$0xff] }
  0x27   : > { %2775 = vmatpush.bf16.msra.mxu2 %v601_v2  ;;  %2776 = vmatpush.bf16.msra.mxu3 %v601_v2  ;;  %v554_v13 = vld [vmem:[#allocation2 + $0x20] sm:$0xff]  ;;  %v553_v16 = vld [vmem:[#allocation2 + $0x18] sm:$0xff]  ;;  %v555_v25 = vld [vmem:[#allocation2 + $0x28] sm:$0xff] }
  0x28   : > { %v557_v26 = vld [vmem:[#allocation2 + $0x38] sm:$0xff] }
  0x29   : > { %2563 = vmatmul.msk.bf16.vlgmr.msra.gmra.mxu0 %vm536_vm0, %v2750_v3  ;;  %2564 = vmatmul.msk.bf16.vlgmr.msra.gmra.mxu1 %vm536_vm0, %v2751_v4 }
  0x2a   : > { %2565 = vmatmul.msk.bf16.vlgmr.msra.gmra.mxu2 %vm536_vm0, %v2752_v5  ;;  %2566 = vmatmul.msk.bf16.vlgmr.msra.gmra.mxu3 %vm536_vm0, %v2753_v6 }
  0xa6   : > { %v612_v9 = vpop.f32.mrf.mxu0  ;;  %v617_v10 = vpop.f32.mrf.mxu1 }
  0xa7   : > { %v632_v11 = vadd.f32 %v612_v9, %v550_v7  ;;  %v634_v12 = vadd.f32 %v617_v10, %v552_v8 }
  0xa9   : > { %640 = vst.msk [vmem:[#allocation2] sm:$0xff] %vm536_vm0, %v632_v11 }
  0xaa   : > { %642 = vst.msk [vmem:[#allocation2 + $0x10] sm:$0xff] %vm536_vm0, %v634_v12 }
  0xad   : > { %v622_v17 = vpop.f32.mrf.mxu2  ;;  %v627_v18 = vpop.f32.mrf.mxu3 }
  0xae   : > { %v636_v19 = vadd.f32 %v622_v17, %v554_v13  ;;  %v638_v20 = vadd.f32 %v627_v18, %v556_v14  ;;  %v614_v21 = vpop.f32.mrf.mxu0  ;;  %v619_v22 = vpop.f32.mrf.mxu1 }
  0xaf   : > { %v633_v23 = vadd.f32 %v614_v21, %v551_v15  ;;  %v635_v24 = vadd.f32 %v619_v22, %v553_v16 }
  0xb0   : > { %644 = vst.msk [vmem:[#allocation2 + $0x20] sm:$0xff] %vm536_vm0, %v636_v19 }
  0xb1   : > { %646 = vst.msk [vmem:[#allocation2 + $0x30] sm:$0xff] %vm536_vm0, %v638_v20 }
  0xb2   : > { %641 = vst.msk [vmem:[#allocation2 + $0x8] sm:$0xff] %vm536_vm0, %v633_v23 }
  0xb3   : > { %643 = vst.msk [vmem:[#allocation2 + $0x18] sm:$0xff] %vm536_vm0, %v635_v24 }
  0xb5   : > { %v624_v27 = vpop.f32.mrf.mxu2  ;;  %v629_v28 = vpop.f32.mrf.mxu3 }
  0xb6   : > { %v637_v29 = vadd.f32 %v624_v27, %v555_v25  ;;  %v639_v30 = vadd.f32 %v629_v28, %v557_v26 }
  0xb8   : > { %645 = vst.msk [vmem:[#allocation2 + $0x28] sm:$0xff] %vm536_vm0, %v637_v29 }
  0xb9   : > { %647 = vst.msk [vmem:[#allocation2 + $0x38] sm:$0xff] %vm536_vm0, %v639_v30 }
  0xba PF: > { %v2567_v31 = vld [vmem:[%s3526_s3 + $0x4] sm:$0xf]  ;;  %vm698_vm2 = vcmask 1043456   ;;  %v2755_v34 = vld [vmem:[%s2985_s12 + $0x8] sm:$0xff]  ;;  %v2756_v35 = vld [vmem:[%s2985_s12 + $0x10] sm:$0xff]  ;;  %p2588_p2 = scmp.gt.s32.totalorder %s2971_s20, 3 }
  0xbb   : > { %v700_v32 = vsel %vm698_vm2, %v2567_v31, 0  ;;  %v2754_v33 = vld [vmem:[%s2985_s12] sm:$0xff]  ;;  %v2757_v36 = vld [vmem:[%s2985_s12 + $0x18] sm:$0xff]  ;;  %v650_v38 = vld [vmem:[#allocation2 + $0x10] sm:$0xff] }
  0xbc   : > { %709 = vmatpush.bf16.msra.mxu0 %v700_v32  ;;  %2777 = vmatpush.bf16.msra.mxu1 %v700_v32  ;;  %v648_v37 = vld [vmem:[#allocation2] sm:$0xff]  ;;  %v654_v44 = vld [vmem:[#allocation2 + $0x30] sm:$0xff]  ;;  %v649_v45 = vld [vmem:[#allocation2 + $0x8] sm:$0xff] }
  0xbd   : > { %2778 = vmatpush.bf16.msra.mxu2 %v700_v32  ;;  %2779 = vmatpush.bf16.msra.mxu3 %v700_v32  ;;  %v652_v43 = vld [vmem:[#allocation2 + $0x20] sm:$0xff]  ;;  %v651_v46 = vld [vmem:[#allocation2 + $0x18] sm:$0xff] }
  0xbf   : > { %2584 = vmatmul.msk.bf16.vlgmr.msra.gmra.mxu0 %vm536_vm0, %v2754_v33  ;;  %2585 = vmatmul.msk.bf16.vlgmr.msra.gmra.mxu1 %vm536_vm0, %v2755_v34  ;;  %v653_v55 = vld [vmem:[#allocation2 + $0x28] sm:$0xff] }
  0xc0   : > { %2586 = vmatmul.msk.bf16.vlgmr.msra.gmra.mxu2 %vm536_vm0, %v2756_v35  ;;  %2587 = vmatmul.msk.bf16.vlgmr.msra.gmra.mxu3 %vm536_vm0, %v2757_v36  ;;  %v655_v56 = vld [vmem:[#allocation2 + $0x38] sm:$0xff] }
 0x13c   : > { %v711_v39 = vpop.f32.mrf.mxu0  ;;  %v716_v40 = vpop.f32.mrf.mxu1 }
 0x13d   : > { %v731_v41 = vadd.f32 %v711_v39, %v648_v37  ;;  %v733_v42 = vadd.f32 %v716_v40, %v650_v38 }
 0x13f   : > { %739 = vst.msk [vmem:[#allocation2] sm:$0xff] %vm536_vm0, %v731_v41 }
 0x140   : > { %741 = vst.msk [vmem:[#allocation2 + $0x10] sm:$0xff] %vm536_vm0, %v733_v42 }
 0x143   : > { %v721_v47 = vpop.f32.mrf.mxu2  ;;  %v726_v48 = vpop.f32.mrf.mxu3 }
 0x144   : > { %v735_v49 = vadd.f32 %v721_v47, %v652_v43  ;;  %v737_v50 = vadd.f32 %v726_v48, %v654_v44  ;;  %v713_v51 = vpop.f32.mrf.mxu0  ;;  %v718_v52 = vpop.f32.mrf.mxu1 }
 0x145   : > { %v732_v53 = vadd.f32 %v713_v51, %v649_v45  ;;  %v734_v54 = vadd.f32 %v718_v52, %v651_v46 }
 0x146   : > { %743 = vst.msk [vmem:[#allocation2 + $0x20] sm:$0xff] %vm536_vm0, %v735_v49 }
 0x147   : > { %745 = vst.msk [vmem:[#allocation2 + $0x30] sm:$0xff] %vm536_vm0, %v737_v50 }
 0x148   : > { %740 = vst.msk [vmem:[#allocation2 + $0x8] sm:$0xff] %vm536_vm0, %v732_v53 }
 0x149   : > { %742 = vst.msk [vmem:[#allocation2 + $0x18] sm:$0xff] %vm536_vm0, %v734_v54 }
 0x14b   : > { %v723_v57 = vpop.f32.mrf.mxu2  ;;  %v728_v58 = vpop.f32.mrf.mxu3  ;;  %751 = sbr.rel (%p2588_p2) target bundleno = 486 (0x1e6), region = 64 }
 0x14c   : > { %v736_v59 = vadd.f32 %v723_v57, %v653_v55  ;;  %v738_v60 = vadd.f32 %v728_v58, %v655_v56 }
 0x14e   : > { %744 = vst.msk [vmem:[#allocation2 + $0x28] sm:$0xff] %vm536_vm0, %v736_v59 }
 0x14f   : > { %746 = vst.msk [vmem:[#allocation2 + $0x38] sm:$0xff] %vm536_vm0, %v738_v60 }
 0x150   : > { %v2589_v61 = vld [vmem:[%s3526_s3 + $0x8] sm:$0xf]  ;;  %v2758_v63 = vld [vmem:[%s2998_s15] sm:$0xff]  ;;  %v2760_v1 = vld [vmem:[%s2998_s15 + $0x10] sm:$0xff] }
 0x151   : > { %v803_v62 = vsel %vm698_vm2, %v2589_v61, 0  ;;  %v2759_v0 = vld [vmem:[%s2998_s15 + $0x8] sm:$0xff]  ;;  %v2761_v2 = vld [vmem:[%s2998_s15 + $0x18] sm:$0xff]  ;;  %v752_v3 = vld [vmem:[#allocation2] sm:$0xff] }
 0x152   : > { %812 = vmatpush.bf16.msra.mxu0 %v803_v62  ;;  %2780 = vmatpush.bf16.msra.mxu1 %v803_v62  ;;  %v754_v4 = vld [vmem:[#allocation2 + $0x10] sm:$0xff]  ;;  %v756_v9 = vld [vmem:[#allocation2 + $0x20] sm:$0xff]  ;;  %v753_v11 = vld [vmem:[#allocation2 + $0x8] sm:$0xff] }
 0x153   : > { %2781 = vmatpush.bf16.msra.mxu2 %v803_v62  ;;  %2782 = vmatpush.bf16.msra.mxu3 %v803_v62  ;;  %v758_v10 = vld [vmem:[#allocation2 + $0x30] sm:$0xff]  ;;  %v755_v12 = vld [vmem:[#allocation2 + $0x18] sm:$0xff] }
 0x155   : > { %2606 = vmatmul.msk.bf16.vlgmr.msra.gmra.mxu0 %vm536_vm0, %v2758_v63  ;;  %2607 = vmatmul.msk.bf16.vlgmr.msra.gmra.mxu1 %vm536_vm0, %v2759_v0  ;;  %v757_v21 = vld [vmem:[#allocation2 + $0x28] sm:$0xff] }
 0x156   : > { %2608 = vmatmul.msk.bf16.vlgmr.msra.gmra.mxu2 %vm536_vm0, %v2760_v1  ;;  %2609 = vmatmul.msk.bf16.vlgmr.msra.gmra.mxu3 %vm536_vm0, %v2761_v2  ;;  %v759_v22 = vld [vmem:[#allocation2 + $0x38] sm:$0xff] }
 0x1d2   : > { %v814_v5 = vpop.f32.mrf.mxu0  ;;  %v819_v6 = vpop.f32.mrf.mxu1 }
 0x1d3   : > { %v834_v7 = vadd.f32 %v814_v5, %v752_v3  ;;  %v836_v8 = vadd.f32 %v819_v6, %v754_v4 }
 0x1d5   : > { %842 = vst.msk [vmem:[#allocation2] sm:$0xff] %vm536_vm0, %v834_v7 }
 0x1d6   : > { %844 = vst.msk [vmem:[#allocation2 + $0x10] sm:$0xff] %vm536_vm0, %v836_v8 }
 0x1d9   : > { %v824_v13 = vpop.f32.mrf.mxu2  ;;  %v829_v14 = vpop.f32.mrf.mxu3 }
 0x1da   : > { %v838_v15 = vadd.f32 %v824_v13, %v756_v9  ;;  %v840_v16 = vadd.f32 %v829_v14, %v758_v10  ;;  %v816_v17 = vpop.f32.mrf.mxu0  ;;  %v821_v18 = vpop.f32.mrf.mxu1 }
 0x1db   : > { %v835_v19 = vadd.f32 %v816_v17, %v753_v11  ;;  %v837_v20 = vadd.f32 %v821_v18, %v755_v12 }
 0x1dc   : > { %846 = vst.msk [vmem:[#allocation2 + $0x20] sm:$0xff] %vm536_vm0, %v838_v15 }
 0x1dd   : > { %848 = vst.msk [vmem:[#allocation2 + $0x30] sm:$0xff] %vm536_vm0, %v840_v16 }
 0x1de   : > { %843 = vst.msk [vmem:[#allocation2 + $0x8] sm:$0xff] %vm536_vm0, %v835_v19 }
 0x1df   : > { %845 = vst.msk [vmem:[#allocation2 + $0x18] sm:$0xff] %vm536_vm0, %v837_v20 }
 0x1e1   : > { %v826_v23 = vpop.f32.mrf.mxu2  ;;  %v831_v24 = vpop.f32.mrf.mxu3 }
 0x1e2   : > { %v839_v25 = vadd.f32 %v826_v23, %v757_v21  ;;  %v841_v26 = vadd.f32 %v831_v24, %v759_v22 }
 0x1e4   : > { %847 = vst.msk [vmem:[#allocation2 + $0x28] sm:$0xff] %vm536_vm0, %v839_v25 }
 0x1e5   : > { %849 = vst.msk [vmem:[#allocation2 + $0x38] sm:$0xff] %vm536_vm0, %v841_v26 }
 0x1e6 PF: > { %v1097_v27 = vld [vmem:[%s3527_s4] sm:$0xf]  ;;  %v853_v28 = vld [vmem:[#allocation2 + $0x18] sm:$0xff]  ;;  %vm880_vm3 = vcmask 57344   ;;  %vm886_vm4 = vsmask.f32 256 }
 0x1e7   : > { %v854_v29 = vld [vmem:[#allocation2 + $0x20] sm:$0xff]  ;;  %v1312_v30 = vsel %vm698_vm2, %v1097_v27, 0  ;;  %v903_v34 = vld [vmem:[#allocation3 + $0x28] sm:$0x1]  ;;  %vm3069_vm5 = vmand %vm880_vm3, %vm886_vm4  ;;  %vm918_vm6 = vsmask.f32 7938 }
 0x1e8   : > { %v3064_v31 = vld [vmem:[%s3529_s6] ss:$0 sm:$0xff]  ;;  %2784 = vmatpush.bf16.msra.mxu3 %v1312_v30  ;;  %1321 = vmatpush.bf16.msra.mxu1 %v1312_v30  ;;  %v2610_v38 = vld [vmem:[%s3527_s4 + $0x4] sm:$0xf]  ;;  %v904_v42 = vsel %vm3069_vm5, 0, %v903_v34  ;;  %vm3083_vm7 = vmand %vm880_vm3, %vm918_vm6  ;;  %vm878_vm8 = vcmask 60416  }
 0x1e9   : > { %v850_v32 = vld [vmem:[#allocation2] sm:$0xff]  ;;  %v865_v35 = vadd.f32 %v3064_v31, %v853_v28  ;;  %v866_v36 = vadd.f32 %v3064_v31, %v854_v29  ;;  %v1248_v44 = vsel %vm698_vm2, %v2610_v38, 0  ;;  %v935_v45 = vld [vmem:[#allocation3 + $0x2c] sm:$0x1]  ;;  %905 = vst [vmem:[#allocation3 + $0x28] sm:$0x1] %v904_v42  ;;  %vm3106_vm9 = vmand %vm878_vm8, %vm918_vm6 }
 0x1ea   : > { %v900_v33 = vld [vmem:[#allocation3 + $0x20] sm:$0x1]  ;;  %v932_v39 = vld [vmem:[#allocation3 + $0x24] sm:$0x1]  ;;  %v862_v40 = vadd.f32 %v3064_v31, %v850_v32  ;;  %2783 = vmatpush.bf16.msra.mxu2 %v1248_v44  ;;  %1257 = vmatpush.bf16.msra.mxu0 %v1248_v44  ;;  %v936_v49 = vsel %vm3083_vm7, 0, %v935_v45  ;;  %v856_v57 = vld [vmem:[#allocation2 + $0x30] sm:$0xff] }
 0x1eb   : > { %v901_v41 = vsel %vm3069_vm5, 0, %v900_v33  ;;  %v873_v46 = vmax.f32 %v865_v35, 0.0  ;;  %v874_v47 = vmax.f32 %v866_v36, 0.0  ;;  %v933_v48 = vsel %vm3083_vm7, 0, %v932_v39  ;;  %v2643_v52 = vld [vmem:[%s3527_s4 + $0x8] sm:$0xf] }
 0x1ec   : > { %902 = vst [vmem:[#allocation3 + $0x20] sm:$0x1] %v901_v41  ;;  %v870_v53 = vmax.f32 %v862_v40, 0.0  ;;  %v855_v54 = vld [vmem:[#allocation2 + $0x28] sm:$0xff]  ;;  %v1429_v55 = vsel %vm698_vm2, %v2643_v52, 0  ;;  %v2871_v63 = vmov 0   ;;  %v868_v3 = vadd.f32 %v3064_v31, %v856_v57 }
 0x1ed   : > { %v953_v50 = vpack.c.bf16 %v873_v46, %v873_v46  ;;  %v954_v51 = vpack.c.bf16 %v874_v47, %v874_v47  ;;  %934 = vst [vmem:[#allocation3 + $0x24] sm:$0x1] %v933_v48  ;;  %v891_v56 = vld [vmem:[#allocation3 + $0x8] sm:$0x1]  ;;  %v867_v58 = vadd.f32 %v3064_v31, %v855_v54  ;;  %v923_v1 = vld [vmem:[#allocation3 + $0xc] sm:$0x1] }
 0x1ee   : > { %937 = vst [vmem:[#allocation3 + $0x2c] sm:$0x1] %v936_v49  ;;  %1438 = vmatpush.bf16.msrb.mxu2 %v1429_v55  ;;  %v892_v0 = vsel %vm3069_vm5, 0, %v891_v56  ;;  %v950_v2 = vpack.c.bf16 %v870_v53, %v870_v53  ;;  %v924_v7 = vsel %vm3083_vm7, 0, %v923_v1  ;;  %v876_v19 = vmax.f32 %v868_v3, 0.0  ;;  %v851_v45 = vld [vmem:[#allocation2 + $0x8] sm:$0xff] }
 0x1ef   : > { %v983_v59 = vshrl.u32 %v953_v50, 16  ;;  %v986_v60 = vshll.u32 %v953_v50, 16  ;;  %v991_v61 = vshrl.u32 %v954_v51, 16  ;;  %v994_v62 = vshll.u32 %v954_v51, 16  ;;  %879 = vst.msk [vmem:[#allocation3] sm:$0xf] %vm878_vm8, %v2871_v63 }
 0x1f0   : > { %881 = vst.msk [vmem:[#allocation3 + $0x4] sm:$0x1] %vm880_vm3, %v2871_v63  ;;  %v875_v4 = vmax.f32 %v867_v58, 0.0  ;;  %v959_v10 = vshrl.u32 %v950_v2, 16  ;;  %v962_v11 = vshll.u32 %v950_v2, 16  ;;  %v3130_v36 = vpack.c.bf16 %v876_v19, %v876_v19  ;;  %v852_v50 = vld [vmem:[#allocation2 + $0x10] sm:$0xff] }
 0x1f1   : > { %v985_v5 = vrot.slane %v983_v59, 7  ;;  %v993_v6 = vrot.slane %v991_v61, 7  ;;  %893 = vst [vmem:[#allocation3 + $0x8] sm:$0x1] %v892_v0  ;;  %v1065_v16 = vld [vmem:[#allocation3 + $0x28] sm:$0xf] }
 0x1f2   : > { %925 = vst [vmem:[#allocation3 + $0xc] sm:$0x1] %v924_v7  ;;  %v961_v18 = vrot.slane %v959_v10, 7  ;;  %v3112_v20 = vpack.c.bf16 %v875_v4, %v875_v4  ;;  %v2648_v25 = vld [vmem:[%s3527_s4 + $0xc] sm:$0xf]  ;;  %v1007_v51 = vshrl.u32 %v3130_v36, 16  ;;  %v3160_v4 = vadd.f32 %v3064_v31, %v852_v50 }
 0x1f3   : > { %v1059_v9 = vld [vmem:[#allocation3 + $0x20] sm:$0xf]  ;;  %v988_v12 = vor.u32 %v986_v60, %v985_v5  ;;  %v989_v13 = vrot.slane %v985_v5, 4  ;;  %v996_v14 = vor.u32 %v994_v62, %v993_v6  ;;  %v997_v15 = vrot.slane %v993_v6, 4  ;;  %883 = vst.msk [vmem:[#allocation3 + $0x48] sm:$0xf] %vm878_vm8, %v2871_v63 }
 0x1f4   : > { %v1062_v17 = vld [vmem:[#allocation3 + $0x24] sm:$0x1]  ;;  %884 = vst.msk [vmem:[#allocation3 + $0x4c] sm:$0x1] %vm880_vm3, %v2871_v63  ;;  %v906_v26 = vld [vmem:[#allocation3 + $0x30] sm:$0x1]  ;;  %v964_v29 = vor.u32 %v962_v11, %v961_v18  ;;  %v3155_v63 = vadd.f32 %v3064_v31, %v851_v45 }
 0x1f5   : > { %v1060_v21 = vsel %vm3106_vm9, %v988_v12, %v1059_v9  ;;  %v1066_v22 = vsel %vm3106_vm9, %v996_v14, %v1065_v16  ;;  %v1063_v23 = vsel %vm3069_vm5, %v989_v13, %v1062_v17  ;;  %v1068_v24 = vld [vmem:[#allocation3 + $0x2c] sm:$0x1]  ;;  %v965_v30 = vrot.slane %v961_v18, 4  ;;  %v3137_v44 = vld [vmem:[#allocation3 + $0x38] sm:$0x1] }
 0x1f6   : > { %1061 = vst [vmem:[#allocation3 + $0x20] sm:$0xf] %v1060_v21  ;;  %v1069_v27 = vsel %vm3069_vm5, %v997_v15, %v1068_v24  ;;  %v888_v28 = vld [vmem:[#allocation3] sm:$0x1]  ;;  %v1511_v32 = vsel %vm698_vm2, %v2648_v25, 0  ;;  %v907_v35 = vsel %vm3069_vm5, 0, %v906_v26 }
 0x1f7   : > { %1067 = vst [vmem:[#allocation3 + $0x28] sm:$0xf] %v1066_v22  ;;  %v889_v33 = vsel %vm3069_vm5, 0, %v888_v28  ;;  %v920_v34 = vld [vmem:[#allocation3 + $0x4] sm:$0x1]  ;;  %1520 = vmatpush.bf16.msrb.mxu3 %v1511_v32  ;;  %v999_v40 = vshrl.u32 %v3112_v20, 16 }
 0x1f8   : > { %1064 = vst [vmem:[#allocation3 + $0x24] sm:$0x1] %v1063_v23  ;;  %vm1106_vm10 = vsmask.f32 3328  ;;  %vm1107_vm11 = vsmask.f32 7440 }
 0x1f9   : > { %v921_v38 = vsel %vm3083_vm7, 0, %v920_v34  ;;  %v1041_v39 = vld [vmem:[#allocation3 + $0x8] sm:$0xf]  ;;  %1070 = vst [vmem:[#allocation3 + $0x2c] sm:$0x1] %v1069_v27  ;;  %v910_v47 = vsel %vm3069_vm5, 0, %v3137_v44  ;;  %vm3175_vm12 = vmor %vm1106_vm10, %vm1107_vm11 }
 0x1fa   : > { %v1042_v41 = vsel %vm3106_vm9, %v964_v29, %v1041_v39  ;;  %v1044_v42 = vld [vmem:[#allocation3 + $0xc] sm:$0x1]  ;;  %890 = vst [vmem:[#allocation3] sm:$0x1] %v889_v33  ;;  %v3144_v48 = vrot.slane %v999_v40, 7  ;;  %v1002_v49 = vshll.u32 %v3112_v20, 16 }
 0x1fb   : > { %v1045_v46 = vsel %vm3069_vm5, %v965_v30, %v1044_v42  ;;  %922 = vst [vmem:[#allocation3 + $0x4] sm:$0x1] %v921_v38  ;;  %v1010_v52 = vshll.u32 %v3130_v36, 16  ;;  %v2669_v53 = vld [vmem:[%s3527_s4 + $0x10] sm:$0xf]  ;;  %v3165_v10 = vrot.slane %v1007_v51, 7 }
 0x1fc   : > { %1043 = vst [vmem:[#allocation3 + $0x8] sm:$0xf] %v1042_v41  ;;  %v1005_v54 = vrot.slane %v3144_v48, 4  ;;  %v1705_v55 = vsel %vm698_vm2, %v2669_v53, 0  ;;  %v938_v56 = vld [vmem:[#allocation3 + $0x34] sm:$0x1]  ;;  %v1004_v27 = vor.u32 %v1002_v49, %v3144_v48 }
 0x1fd   : > { %v2625_v57 = vld [vmem:[#allocation3 + $0x20] sm:$0xf]  ;;  %1046 = vst [vmem:[#allocation3 + $0xc] sm:$0x1] %v1045_v46  ;;  %1714 = vmatpush.bf16.msrb.mxu0 %v1705_v55  ;;  %v939_v15 = vsel %vm3083_vm7, 0, %v938_v56  ;;  %v1012_v55 = vor.u32 %v1010_v52, %v3165_v10  ;;  %v871_v36 = vmax.f32 %v3155_v63, 0.0 }
 0x1fe   : > { %v1093_v58 = vld [vmem:[#allocation3 + $0x20] sm:$0xf]  ;;  %v2764_v59 = vld [vmem:[#allocation3 + $0x24] sm:$0xf0]  ;;  %908 = vst [vmem:[#allocation3 + $0x30] sm:$0x1] %v907_v35 }
 0x1ff   : > { %v1094_v60 = vld [vmem:[#allocation3 + $0x28] sm:$0xf]  ;;  %v1166_v61 = vshrl.u32 %v1093_v58, 16  ;;  %v1169_v62 = vshll.u32 %v1093_v58, 16  ;;  %v2626_v0 = vor.u32 %v2764_v59, %v2625_v57  ;;  %v3157_v1 = vld [vmem:[#allocation3 + $0x24] sm:$0x1] }
 0x200   : > { %v1180_v2 = vshrl.u32 %v1094_v60, 16  ;;  %v1183_v3 = vshll.u32 %v1094_v60, 16  ;;  %v3162_v5 = vld [vmem:[#allocation3 + $0x2c] sm:$0x1]  ;;  %v1175_v9 = vshll.u32 %v3157_v1, 16  ;;  %v872_v52 = vmax.f32 %v3160_v4, 0.0 }
 0x201   : > { %v1168_v6 = vrot.slane %v1166_v61, 4  ;;  %v1171_v7 = vrot.slane %v1169_v62, 5  ;;  %2633 = vmatmul.msk.bf16.vlgmr.msra.gmra.mxu3 %vm536_vm0, %v2626_v0  ;;  %v1189_v13 = vshll.u32 %v3162_v5, 16  ;;  %v1089_v14 = vld [vmem:[#allocation3] sm:$0xf]  ;;  %vm1367_vm13 = vcmask 1042432  }
 0x202   : > { %v1182_v11 = vrot.slane %v1180_v2, 4  ;;  %v1185_v12 = vrot.slane %v1183_v3, 5  ;;  %v1177_v17 = vrot.slane %v1175_v9, 5  ;;  %v3171_v18 = vld [vmem:[#allocation3 + $0x4] sm:$0x1]  ;;  %v1110_v19 = vshrl.u32 %v1089_v14, 16 }
 0x203   : > { %v1172_v16 = vor.u32 %v1171_v7, %v1168_v6  ;;  %v1113_v20 = vshll.u32 %v1089_v14, 16  ;;  %v1191_v23 = vrot.slane %v1189_v13, 5  ;;  %v1090_v24 = vld [vmem:[#allocation3 + $0x8] sm:$0xf]  ;;  %v1119_v25 = vshll.u32 %v3171_v18, 16 }
 0x204   : > { %v1186_v22 = vor.u32 %v1185_v12, %v1182_v11  ;;  %v2617_v26 = vld [vmem:[#allocation3] sm:$0xf]  ;;  %v3181_v29 = vld [vmem:[#allocation3 + $0xc] sm:$0x1]  ;;  %v1112_v30 = vrot.slane %v1110_v19, 4  ;;  %v1124_v33 = vshrl.u32 %v1090_v24, 16  ;;  %v951_v12 = vpack.c.bf16 %v871_v36, %v871_v36 }
 0x205   : > { %v1173_v28 = vrot.slane %v1172_v16, 4  ;;  %v1115_v32 = vrot.slane %v1113_v20, 5  ;;  %v1121_v35 = vrot.slane %v1119_v25, 5  ;;  %v1127_v38 = vshll.u32 %v1090_v24, 16  ;;  %v2762_v40 = vld [vmem:[#allocation3 + $0x4] sm:$0xf0] }
 0x206   : > { %v1187_v34 = vrot.slane %v1186_v22, 4  ;;  %v1133_v39 = vshll.u32 %v3181_v29, 16  ;;  %v1126_v45 = vrot.slane %v1124_v33, 4  ;;  %v2618_v46 = vor.u32 %v2762_v40, %v2617_v26  ;;  %911 = vst [vmem:[#allocation3 + $0x38] sm:$0x1] %v910_v47 }
 0x207   : > { %v1178_v41 = vsel %vm3175_vm12, %v1173_v28, %v1177_v17  ;;  %v1116_v42 = vor.u32 %v1115_v32, %v1112_v30  ;;  %v1071_v49 = vld [vmem:[#allocation3 + $0x30] sm:$0xf]  ;;  %v1129_v53 = vrot.slane %v1127_v38, 5  ;;  %940 = vst [vmem:[#allocation3 + $0x34] sm:$0x1] %v939_v15  ;;  %v952_v14 = vpack.c.bf16 %v872_v52, %v872_v52 }
 0x208   : > { %v1192_v50 = vsel %vm3175_vm12, %v1187_v34, %v1191_v23  ;;  %v1227_v51 = vunpack.c.l.b16 %v1178_v41  ;;  %v941_v56 = vld [vmem:[#allocation3 + $0x3c] sm:$0x1]  ;;  %v1135_v59 = vrot.slane %v1133_v39, 5  ;;  %2631 = vmatmul.msk.bf16.vlgmr.msra.gmra.mxu1 %vm536_vm0, %v2618_v46  ;;  %v1072_v44 = vsel %vm3106_vm9, %v1004_v27, %v1071_v49  ;;  %v894_v47 = vld [vmem:[#allocation3 + $0x10] sm:$0x1] }
 0x209   : > { %v1228_v57 = vunpack.c.l.b16 %v1192_v50  ;;  %v1117_v58 = vrot.slane %v1116_v42, 4  ;;  %v897_v60 = vld [vmem:[#allocation3 + $0x18] sm:$0x1]  ;;  %v1130_v61 = vor.u32 %v1129_v53, %v1126_v45  ;;  %1073 = vst [vmem:[#allocation3 + $0x30] sm:$0xf] %v1072_v44  ;;  %v942_v62 = vsel %vm3083_vm7, 0, %v941_v56 }
 0x20a   : > { %943 = vst [vmem:[#allocation3 + $0x3c] sm:$0x1] %v942_v62  ;;  %v895_v3 = vsel %vm3069_vm5, 0, %v894_v47  ;;  %v898_v6 = vsel %vm3069_vm5, 0, %v897_v60  ;;  %v926_v7 = vld [vmem:[#allocation3 + $0x14] sm:$0x1] }
 0x20b   : > { %v1233_v0 = vpack.c.b16 %v1228_v57, %v1227_v51  ;;  %v1122_v2 = vsel %vm3175_vm12, %v1117_v58, %v1121_v35  ;;  %v1131_v9 = vrot.slane %v1130_v61, 4  ;;  %896 = vst [vmem:[#allocation3 + $0x10] sm:$0x1] %v895_v3  ;;  %v927_v11 = vsel %vm3083_vm7, 0, %v926_v7  ;;  %v929_v63 = vld [vmem:[#allocation3 + $0x1c] sm:$0x1] }
 0x20c   : > { %v1223_v4 = vunpack.c.l.b16 %v1122_v2  ;;  %899 = vst [vmem:[#allocation3 + $0x18] sm:$0x1] %v898_v6  ;;  %v930_v13 = vsel %vm3083_vm7, 0, %v929_v63  ;;  %v967_v17 = vshrl.u32 %v951_v12, 16  ;;  %v970_v19 = vshll.u32 %v951_v12, 16 }
 0x20d   : > { %2613 = vmatmul.msk.bf16.vlgmr.msra.gmra.mxu2 %vm536_vm0, %v1233_v0  ;;  %v1136_v15 = vsel %vm3175_vm12, %v1131_v9, %v1135_v59  ;;  %v1077_v16 = vld [vmem:[#allocation3 + $0x38] sm:$0xf]  ;;  %928 = vst [vmem:[#allocation3 + $0x14] sm:$0x1] %v927_v11  ;;  %v1013_v22 = vrot.slane %v3165_v10, 4  ;;  %v975_v25 = vshrl.u32 %v952_v14, 16 }
 0x20e   : > { %v1224_v20 = vunpack.c.l.b16 %v1136_v15  ;;  %v1078_v23 = vsel %vm3106_vm9, %v1012_v55, %v1077_v16  ;;  %v1074_v24 = vld [vmem:[#allocation3 + $0x34] sm:$0x1]  ;;  %931 = vst [vmem:[#allocation3 + $0x1c] sm:$0x1] %v930_v13  ;;  %v969_v27 = vrot.slane %v967_v17, 7  ;;  %v978_v32 = vshll.u32 %v952_v14, 16 }
 0x20f   : > { %1079 = vst [vmem:[#allocation3 + $0x38] sm:$0xf] %v1078_v23  ;;  %v1075_v26 = vsel %vm3069_vm5, %v1005_v54, %v1074_v24  ;;  %v977_v48 = vrot.slane %v975_v25, 7  ;;  %v2687_v0 = vld [vmem:[%s3527_s4 + $0x18] sm:$0xf]  ;;  %vm1368_vm14 = vcmask 1046532  }
 0x210   : > { %v1231_v28 = vpack.c.b16 %v1224_v20, %v1223_v4  ;;  %1076 = vst [vmem:[#allocation3 + $0x34] sm:$0x1] %v1075_v26  ;;  %v1095_v30 = vld [vmem:[#allocation3 + $0x30] sm:$0xf]  ;;  %v972_v35 = vor.u32 %v970_v19, %v969_v27  ;;  %v973_v38 = vrot.slane %v969_v27, 4  ;;  %v1910_v6 = vsel %vm698_vm2, %v2687_v0, 0  ;;  %vm3258_vm15 = vmor %vm1367_vm13, %vm1368_vm14 }
 0x211   : > { %v1080_v33 = vld [vmem:[#allocation3 + $0x3c] sm:$0x1]  ;;  %v1194_v34 = vshrl.u32 %v1095_v30, 16  ;;  %v1197_v10 = vshll.u32 %v1095_v30, 16  ;;  %v2629_v39 = vld [vmem:[#allocation3 + $0x30] sm:$0xf]  ;;  %v980_v49 = vor.u32 %v978_v32, %v977_v48  ;;  %1919 = vmatpush.bf16.msra.mxu2 %v1910_v6 }
 0x212   : > { %2611 = vmatmul.msk.bf16.vlgmr.msra.gmra.mxu0 %vm536_vm0, %v1231_v28  ;;  %v1081_v40 = vsel %vm3069_vm5, %v1013_v22, %v1080_v33  ;;  %v1047_v41 = vld [vmem:[#allocation3 + $0x10] sm:$0xf]  ;;  %v981_v50 = vrot.slane %v977_v48, 4  ;;  %v1343_v11 = vld [vmem:[#allocation3] sm:$0xe]  ;;  %v1372_v24 = vrot.slane %v3171_v18, 5 }
 0x213   : > { %1082 = vst [vmem:[#allocation3 + $0x3c] sm:$0x1] %v1081_v40  ;;  %v1196_v54 = vrot.slane %v1194_v34, 4  ;;  %v1199_v42 = vrot.slane %v1197_v10, 5  ;;  %v1048_v45 = vsel %vm3106_vm9, %v972_v35, %v1047_v41  ;;  %v1053_v46 = vld [vmem:[#allocation3 + $0x18] sm:$0xf] }
 0x214   : > { %1049 = vst [vmem:[#allocation3 + $0x10] sm:$0xf] %v1048_v45  ;;  %v1050_v51 = vld [vmem:[#allocation3 + $0x14] sm:$0x1]  ;;  %v1054_v59 = vsel %vm3106_vm9, %v980_v49, %v1053_v46  ;;  %v1550_v16 = vld [vmem:[#allocation3 + $0x8] sm:$0xf] }
 0x215   : > { %v1200_v53 = vor.u32 %v1199_v42, %v1196_v54  ;;  %v1051_v55 = vsel %vm3069_vm5, %v973_v38, %v1050_v51  ;;  %v1056_v56 = vld [vmem:[#allocation3 + $0x1c] sm:$0x1]  ;;  %1055 = vst [vmem:[#allocation3 + $0x18] sm:$0xf] %v1054_v59  ;;  %v1344_v22 = vld [vmem:[#allocation3 + $0x8] sm:$0xe] }
 0x216   : > { %v2765_v57 = vld [vmem:[#allocation3 + $0x34] sm:$0xf0]  ;;  %1052 = vst [vmem:[#allocation3 + $0x14] sm:$0x1] %v1051_v55  ;;  %v1057_v44 = vsel %vm3069_vm5, %v981_v50, %v1056_v56  ;;  %v2635_v23 = vrot.slane %v1343_v11, 9  ;;  %v1567_v35 = vshrl.u32 %v1550_v16, 16 }
 0x217   : > { %v1096_v58 = vld [vmem:[#allocation3 + $0x38] sm:$0xf]  ;;  %v2630_v47 = vor.u32 %v2765_v57, %v2629_v39  ;;  %v3233_v60 = vld [vmem:[#allocation3 + $0x34] sm:$0x1]  ;;  %v1201_v36 = vrot.slane %v1200_v53, 4  ;;  %v1570_v38 = vshll.u32 %v1550_v16, 16 }
 0x218   : > { %v1208_v61 = vshrl.u32 %v1096_v58, 16  ;;  %v1211_v62 = vshll.u32 %v1096_v58, 16  ;;  %v1203_v52 = vshll.u32 %v3233_v60, 16  ;;  %1058 = vst [vmem:[#allocation3 + $0x1c] sm:$0x1] %v1057_v44  ;;  %v1376_v18 = vrot.slane %v3181_v29, 5 }
 0x219   : > { %2634 = vmatmul.msk.bf16.gmra.mxu3 %vm536_vm0, %v2630_v47  ;;  %v2651_v10 = vld [vmem:[#allocation3 + $0x8] sm:$0xf]  ;;  %v2636_v57 = vrot.slane %v1344_v22, 9  ;;  %v2708_v29 = vld [vmem:[%s3527_s4 + $0x1c] sm:$0xf]  ;;  %v1569_v59 = vrot.slane %v1567_v35, 4 }
 0x21a   : > { %v1210_v2 = vrot.slane %v1208_v61, 4  ;;  %v1213_v3 = vrot.slane %v1211_v62, 5  ;;  %v3241_v7 = vld [vmem:[#allocation3 + $0x3c] sm:$0x1]  ;;  %v1205_v9 = vrot.slane %v1203_v52, 5  ;;  %v1572_v44 = vrot.slane %v1570_v38, 5 }
 0x21b   : > { %v1217_v12 = vshll.u32 %v3241_v7, 16  ;;  %v1091_v4 = vld [vmem:[#allocation3 + $0x10] sm:$0xf]  ;;  %v2682_v61 = vld [vmem:[%s3527_s4 + $0x14] sm:$0xf]  ;;  %vm2338_vm1 = vcmask 130048  }
 0x21c   : > { %v1214_v63 = vor.u32 %v1213_v3, %v1210_v2  ;;  %v1206_v13 = vsel %vm3175_vm12, %v1201_v36, %v1205_v9  ;;  %v1138_v14 = vshrl.u32 %v1091_v4, 16  ;;  %v1141_v15 = vshll.u32 %v1091_v4, 16  ;;  %v2621_v30 = vld [vmem:[#allocation3 + $0x10] sm:$0xf]  ;;  %v1092_v33 = vld [vmem:[#allocation3 + $0x18] sm:$0xf] }
 0x21d   : > { %v1219_v19 = vrot.slane %v1217_v12, 5  ;;  %v3246_v20 = vld [vmem:[#allocation3 + $0x14] sm:$0x1]  ;;  %v1229_v25 = vunpack.c.l.b16 %v1206_v13  ;;  %v2763_v34 = vld [vmem:[#allocation3 + $0x14] sm:$0xf0]  ;;  %v1152_v41 = vshrl.u32 %v1092_v33, 16  ;;  %v1373_v36 = vsel %vm3258_vm15, %v2635_v23, %v1372_v24 }
 0x21e   : > { %v1215_v17 = vrot.slane %v1214_v63, 4  ;;  %v1140_v26 = vrot.slane %v1138_v14, 4  ;;  %v1143_v27 = vrot.slane %v1141_v15, 5  ;;  %v1147_v28 = vshll.u32 %v3246_v20, 16  ;;  %v1552_v54 = vld [vmem:[#allocation3 + $0x10] sm:$0xf] }
 0x21f   : > { %v3252_v40 = vld [vmem:[#allocation3 + $0x1c] sm:$0x1]  ;;  %v1155_v45 = vshll.u32 %v1092_v33, 16  ;;  %v2622_v49 = vor.u32 %v2763_v34, %v2621_v30  ;;  %v2766_v50 = vld [vmem:[#allocation3 + $0xc] sm:$0xf0]  ;;  %v1154_v56 = vrot.slane %v1152_v41, 4  ;;  %v1377_v4 = vsel %vm3258_vm15, %v2636_v57, %v1376_v18 }
 0x220   : > { %v1220_v32 = vsel %vm3175_vm12, %v1215_v17, %v1219_v19  ;;  %v1144_v48 = vor.u32 %v1143_v27, %v1140_v26  ;;  %v1149_v42 = vrot.slane %v1147_v28, 5  ;;  %v1161_v46 = vshll.u32 %v3252_v40, 16  ;;  %v1551_v52 = vld [vmem:[#allocation3 + $0xc] sm:$0x1]  ;;  %v2721_v2 = vld [vmem:[%s3527_s4 + $0x20] sm:$0xf] }
 0x221   : > { %v1230_v39 = vunpack.c.l.b16 %v1220_v32  ;;  %v1157_v58 = vrot.slane %v1155_v45, 5  ;;  %2632 = vmatmul.msk.bf16.gmra.mxu1 %vm536_vm0, %v2622_v49  ;;  %v1581_v47 = vshrl.u32 %v1552_v54, 16  ;;  %v2652_v62 = vor.u32 %v2766_v50, %v2651_v10  ;;  %v1553_v11 = vld [vmem:[#allocation3 + $0x14] sm:$0x1]  ;;  %v1744_v12 = vld [vmem:[#allocation3 + $0x8] sm:$0xe] }
 0x222   : > { %v1145_v55 = vrot.slane %v1144_v48, 4  ;;  %v1584_v0 = vshll.u32 %v1552_v54, 16  ;;  %v1163_v9 = vrot.slane %v1161_v46, 5  ;;  %v2104_v14 = vsel %vm698_vm2, %v2708_v29, 0  ;;  %v1745_v16 = vld [vmem:[#allocation3 + $0x10] sm:$0xe] }
 0x223   : > { %v1234_v53 = vpack.c.b16 %v1230_v39, %v1229_v25  ;;  %v1158_v6 = vor.u32 %v1157_v58, %v1154_v56  ;;  %v1583_v63 = vrot.slane %v1581_v47, 4  ;;  %v1827_v15 = vsel %vm698_vm2, %v2682_v61, 0  ;;  %2113 = vmatpush.bf16.msra.mxu3 %v2104_v14  ;;  %v1554_v39 = vld [vmem:[#allocation3 + $0x18] sm:$0xf]  ;;  %v2767_v61 = vld [vmem:[#allocation3 + $0x1c] sm:$0xf0] }
 0x224   : > { %v1150_v3 = vsel %vm3175_vm12, %v1145_v55, %v1149_v42  ;;  %v1586_v13 = vrot.slane %v1584_v0, 5  ;;  %v1573_v19 = vor.u32 %v1572_v44, %v1569_v59  ;;  %v1576_v22 = vshll.u32 %v1551_v52, 16  ;;  %1836 = vmatpush.bf16.msrb.mxu1 %v1827_v15  ;;  %v1556_v42 = vld [vmem:[#allocation3 + $0x20] sm:$0xf]  ;;  %v1346_v55 = vld [vmem:[#allocation3 + $0x18] sm:$0xe] }
 0x225   : > { %2614 = vmatmul.msk.bf16.gmra.mxu2 %vm536_vm0, %v1234_v53  ;;  %v1159_v17 = vrot.slane %v1158_v6, 4  ;;  %v2226_v23 = vsel %vm698_vm2, %v2721_v2, 0  ;;  %v1225_v24 = vunpack.c.l.b16 %v1150_v3  ;;  %v1590_v25 = vshll.u32 %v1553_v11, 16  ;;  %v1345_v53 = vld [vmem:[#allocation3 + $0x10] sm:$0xe] }
 0x226   : > { %2235 = vmatpush.bf16.msra.mxu0 %v2226_v23  ;;  %v2674_v26 = vrot.slane %v1744_v12, 9  ;;  %v1770_v27 = vrot.slane %v1551_v52, 5  ;;  %v1587_v30 = vor.u32 %v1586_v13, %v1583_v63  ;;  %v2675_v32 = vrot.slane %v1745_v16, 9  ;;  %v2655_v47 = vld [vmem:[#allocation3 + $0x18] sm:$0xf] }
 0x227   : > { %v1164_v28 = vsel %vm3175_vm12, %v1159_v17, %v1163_v9  ;;  %v1774_v33 = vrot.slane %v1553_v11, 5  ;;  %v1404_v41 = vunpack.c.l.b16 %v1373_v36  ;;  %v1405_v18 = vunpack.c.l.b16 %v1377_v4  ;;  %v1555_v52 = vld [vmem:[#allocation3 + $0x1c] sm:$0x1]  ;;  %v1746_v0 = vld [vmem:[#allocation3 + $0x18] sm:$0xe] }
 0x228   : > { %v1226_v34 = vunpack.c.l.b16 %v1164_v28  ;;  %v1771_v10 = vsel %vm3258_vm15, %v2674_v26, %v1770_v27  ;;  %v1574_v45 = vrot.slane %v1573_v19, 4  ;;  %v1578_v46 = vrot.slane %v1576_v22, 5  ;;  %v1747_v11 = vld [vmem:[#allocation3 + $0x20] sm:$0xe]  ;;  %v1348_v15 = vld [vmem:[#allocation3 + $0x28] sm:$0xe] }
 0x229   : > { %2665 = vmatmul.msk.bf16.vlgmr.msrb.gmra.mxu3 %vm536_vm0, %v2652_v62  ;;  %v1775_v35 = vsel %vm3258_vm15, %v2675_v32, %v1774_v33  ;;  %v1802_v38 = vunpack.c.l.b16 %v1771_v10  ;;  %v1588_v49 = vrot.slane %v1587_v30, 4  ;;  %v1592_v50 = vrot.slane %v1590_v25, 5  ;;  %v1347_v63 = vld [vmem:[#allocation3 + $0x20] sm:$0xe] }
 0x22a   : > { %v1232_v48 = vpack.c.b16 %v1226_v34, %v1225_v24  ;;  %v1803_v54 = vunpack.c.l.b16 %v1775_v35  ;;  %v1595_v56 = vshrl.u32 %v1554_v39, 16  ;;  %v1598_v57 = vshll.u32 %v1554_v39, 16  ;;  %v2694_v43 = vld [vmem:[#allocation3 + $0x20] sm:$0xf] }
 0x22b   : > { %v1609_v58 = vshrl.u32 %v1556_v42, 16  ;;  %v1612_v59 = vshll.u32 %v1556_v42, 16  ;;  %v1412_v44 = vpack.c.b16 %v1405_v18, %v1404_v41  ;;  %v2637_v62 = vrot.slane %v1345_v53, 9  ;;  %v857_v18 = vld [vmem:[#allocation2 + $0x38] sm:$0xff]  ;;  %v2289_v51 = vld [vmem:[%s3528_s5] sm:$0xf] }
 0x22c   : > { %2612 = vmatmul.msk.bf16.gmra.mxu0 %vm536_vm0, %v1232_v48  ;;  %v1810_v29 = vpack.c.b16 %v1803_v54, %v1802_v38  ;;  %v1380_v36 = vrot.slane %v3246_v20, 5  ;;  %v1579_v2 = vsel %vm3175_vm12, %v1574_v45, %v1578_v46  ;;  %v1593_v3 = vsel %vm3175_vm12, %v1588_v49, %v1592_v50  ;;  %v1557_v20 = vld [vmem:[#allocation3 + $0x24] sm:$0x1]  ;;  %v912_v54 = vld [vmem:[#allocation3 + $0x40] sm:$0x1] }
 0x22d   : > { %v2638_v6 = vrot.slane %v1346_v55, 9  ;;  %v1384_v9 = vrot.slane %v3252_v40, 5  ;;  %v1597_v12 = vrot.slane %v1595_v56, 4  ;;  %v1600_v4 = vrot.slane %v1598_v57, 5  ;;  %v944_v45 = vld [vmem:[#allocation3 + $0x44] sm:$0x1] }
 0x22e   : > { %v1611_v13 = vrot.slane %v1609_v58, 4  ;;  %v1614_v14 = vrot.slane %v1612_v59, 5  ;;  %v2676_v16 = vrot.slane %v1746_v0, 9  ;;  %v1778_v17 = vrot.slane %v1555_v52, 5  ;;  %v1558_v55 = vld [vmem:[#allocation3 + $0x28] sm:$0xf] }
 0x22f   : > { %v2639_v19 = vrot.slane %v1347_v63, 9  ;;  %v1388_v22 = vrot.slane %v3157_v1, 5  ;;  %v2677_v23 = vrot.slane %v1747_v11, 9  ;;  %v1782_v24 = vrot.slane %v1557_v20, 5  ;;  %v1748_v11 = vld [vmem:[#allocation3 + $0x28] sm:$0xe] }
 0x230   : > { %v2640_v40 = vrot.slane %v1348_v15, 9  ;;  %v1392_v25 = vrot.slane %v3162_v5, 5  ;;  %v1680_v26 = vunpack.c.l.b16 %v1579_v2  ;;  %v2656_v27 = vor.u32 %v2767_v61, %v2655_v47  ;;  %v2659_v2 = vld [vmem:[#allocation3 + $0x28] sm:$0xf] }
 0x231   : > { %2683 = vmatmul.msk.bf16.vlgmr.msrb.gmra.mxu1 %vm536_vm0, %v1810_v29  ;;  %v1389_v28 = vsel %vm3258_vm15, %v2639_v19, %v1388_v22  ;;  %v1681_v30 = vunpack.c.l.b16 %v1593_v3  ;;  %v1604_v32 = vshll.u32 %v1555_v52, 16  ;;  %v1381_v1 = vsel %vm3258_vm15, %v2637_v62, %v1380_v36  ;;  %v1560_v52 = vld [vmem:[#allocation3 + $0x30] sm:$0xf] }
 0x232   : > { %v1393_v33 = vsel %vm3258_vm15, %v2640_v40, %v1392_v25  ;;  %v1408_v34 = vunpack.c.l.b16 %v1389_v28  ;;  %v1385_v10 = vsel %vm3258_vm15, %v2638_v6, %v1384_v9  ;;  %v1618_v35 = vshll.u32 %v1557_v20, 16  ;;  %v2768_v3 = vld [vmem:[#allocation3 + $0x2c] sm:$0xf0]  ;;  %v1559_v6 = vld [vmem:[#allocation3 + $0x2c] sm:$0x1] }
 0x233   : > { %v1409_v38 = vunpack.c.l.b16 %v1393_v33  ;;  %v1601_v5 = vor.u32 %v1600_v4, %v1597_v12  ;;  %v1615_v39 = vor.u32 %v1614_v14, %v1611_v13  ;;  %v1779_v48 = vsel %vm3258_vm15, %v2676_v16, %v1778_v17  ;;  %v1349_v13 = vld [vmem:[#allocation3 + $0x30] sm:$0xe]  ;;  %v1350_v14 = vld [vmem:[#allocation3 + $0x38] sm:$0xe] }
 0x234   : > { %v1783_v41 = vsel %vm3258_vm15, %v2677_v23, %v1782_v24  ;;  %v1688_v46 = vpack.c.b16 %v1681_v30, %v1680_v26  ;;  %v1406_v49 = vunpack.c.l.b16 %v1381_v1  ;;  %v1407_v50 = vunpack.c.l.b16 %v1385_v10  ;;  %v1749_v22 = vld [vmem:[#allocation3 + $0x30] sm:$0xe]  ;;  %v1561_v23 = vld [vmem:[#allocation3 + $0x34] sm:$0x1] }
 0x235   : > { %2644 = vmatmul.msk.bf16.vlgmr.msrb.gmra.mxu2 %vm536_vm0, %v1412_v44  ;;  %v3313_v42 = vpack.c.b16 %v1409_v38, %v1408_v34  ;;  %v1606_v53 = vrot.slane %v1604_v32, 5  ;;  %v1804_v56 = vunpack.c.l.b16 %v1779_v48  ;;  %v1805_v57 = vunpack.c.l.b16 %v1783_v41 }
 0x236   : > { %v869_v29 = vadd.f32 %v3064_v31, %v857_v18  ;;  %v913_v58 = vsel %vm3069_vm5, 0, %v912_v54  ;;  %v1602_v59 = vrot.slane %v1601_v5, 4  ;;  %v1616_v44 = vrot.slane %v1615_v39, 4 }
 0x237   : > { %v1620_v47 = vrot.slane %v1618_v35, 5  ;;  %914 = vst [vmem:[#allocation3 + $0x40] sm:$0x1] %v913_v58  ;;  %v945_v61 = vsel %vm3083_vm7, 0, %v944_v45  ;;  %v1623_v62 = vshrl.u32 %v1558_v55, 16  ;;  %v1626_v0 = vshll.u32 %v1558_v55, 16 }
 0x238   : > { %v877_v36 = vmax.f32 %v869_v29, 0.0  ;;  %946 = vst [vmem:[#allocation3 + $0x44] sm:$0x1] %v945_v61  ;;  %v1811_v31 = vpack.c.b16 %v1805_v57, %v1804_v56  ;;  %v1413_v63 = vpack.c.b16 %v1407_v50, %v1406_v49  ;;  %v1607_v12 = vsel %vm3175_vm12, %v1602_v59, %v1606_v53  ;;  %v1949_v59 = vld [vmem:[#allocation3 + $0x10] sm:$0xf] }
 0x239   : > { %2666 = vmatmul.msk.bf16.gmra.mxu3 %vm536_vm0, %v2656_v27  ;;  %v1621_v4 = vsel %vm3175_vm12, %v1616_v44, %v1620_v47  ;;  %v1396_v15 = vrot.slane %v3233_v60, 5  ;;  %v1625_v20 = vrot.slane %v1623_v62, 4  ;;  %v1637_v16 = vshrl.u32 %v1560_v52, 16  ;;  %v1951_v61 = vld [vmem:[#allocation3 + $0x18] sm:$0xf] }
 0x23a   : > { %v957_v9 = vpack.c.bf16 %v877_v36, %v877_v36  ;;  %v1628_v24 = vrot.slane %v1626_v0, 5  ;;  %v1640_v40 = vshll.u32 %v1560_v52, 16  ;;  %v1786_v25 = vrot.slane %v1559_v6, 5  ;;  %v1562_v52 = vld [vmem:[#allocation3 + $0x38] sm:$0xf] }
 0x23b   : > { %v2641_v26 = vrot.slane %v1349_v13, 9  ;;  %v2678_v28 = vrot.slane %v1748_v11, 9  ;;  %v1790_v30 = vrot.slane %v1561_v23, 5  ;;  %v2642_v32 = vrot.slane %v1350_v14, 9 }
 0x23c   : > { %2670 = vmatmul.msk.bf16.vlgmr.msrb.gmra.mxu0 %vm536_vm0, %v1688_v46  ;;  %v1015_v17 = vshrl.u32 %v957_v9, 16  ;;  %v1018_v19 = vshll.u32 %v957_v9, 16  ;;  %v2660_v33 = vor.u32 %v2768_v3, %v2659_v2  ;;  %v2679_v34 = vrot.slane %v1749_v22, 9 }
 0x23d   : > { %v1397_v1 = vsel %vm3258_vm15, %v2641_v26, %v1396_v15  ;;  %v1400_v10 = vrot.slane %v3241_v7, 5  ;;  %v1682_v38 = vunpack.c.l.b16 %v1607_v12  ;;  %v1683_v41 = vunpack.c.l.b16 %v1621_v4  ;;  %v2663_v12 = vld [vmem:[#allocation3 + $0x38] sm:$0xf]  ;;  %v1563_v15 = vld [vmem:[#allocation3 + $0x3c] sm:$0x1] }
 0x23e   : > { %v1017_v27 = vrot.slane %v1015_v17, 7  ;;  %v1083_v60 = vld [vmem:[#allocation3 + $0x40] sm:$0xf]  ;;  %v1410_v48 = vunpack.c.l.b16 %v1397_v1  ;;  %v1639_v18 = vrot.slane %v1637_v16, 4  ;;  %v1642_v54 = vrot.slane %v1640_v40, 5 }
 0x23f   : > { %v1086_v35 = vld [vmem:[#allocation3 + $0x44] sm:$0x1]  ;;  %v1401_v45 = vsel %vm3258_vm15, %v2642_v32, %v1400_v10  ;;  %v1629_v53 = vor.u32 %v1628_v24, %v1625_v20  ;;  %v1632_v7 = vshll.u32 %v1559_v6, 16  ;;  %v1787_v55 = vsel %vm3258_vm15, %v2678_v28, %v1786_v25  ;;  %v1750_v17 = vld [vmem:[#allocation3 + $0x38] sm:$0xe] }
 0x240   : > { %v1020_v5 = vor.u32 %v1018_v19, %v1017_v27  ;;  %v1021_v39 = vrot.slane %v1017_v27, 4  ;;  %v1411_v49 = vunpack.c.l.b16 %v1401_v45  ;;  %v1791_v56 = vsel %vm3258_vm15, %v2679_v34, %v1790_v30  ;;  %v3349_v24 = vld [vmem:[#allocation3 + $0x14] sm:$0x1]  ;;  %v3352_v32 = vld [vmem:[#allocation3 + $0x1c] sm:$0x1] }
 0x241   : > { %2684 = vmatmul.msk.bf16.gmra.mxu1 %vm536_vm0, %v1811_v31  ;;  %v1689_v8 = vpack.c.b16 %v1683_v41, %v1682_v38  ;;  %v1643_v29 = vor.u32 %v1642_v54, %v1639_v18  ;;  %v1646_v58 = vshll.u32 %v1561_v23, 16  ;;  %v1806_v44 = vunpack.c.l.b16 %v1787_v55 }
 0x242   : > { %v1084_v46 = vsel %vm3106_vm9, %v1020_v5, %v1083_v60  ;;  %v1087_v50 = vsel %vm3069_vm5, %v1021_v39, %v1086_v35  ;;  %v3342_v57 = vpack.c.b16 %v1411_v49, %v1410_v48  ;;  %v1807_v47 = vunpack.c.l.b16 %v1791_v56 }
 0x243   : > { %1085 = vst [vmem:[#allocation3 + $0x40] sm:$0xf] %v1084_v46  ;;  %v1630_v62 = vrot.slane %v1629_v53, 4  ;;  %v1634_v36 = vrot.slane %v1632_v7, 5  ;;  %v1966_v0 = vshrl.u32 %v1949_v59, 16  ;;  %v1969_v2 = vshll.u32 %v1949_v59, 16 }
 0x244   : > { %1088 = vst [vmem:[#allocation3 + $0x44] sm:$0x1] %v1087_v50  ;;  %v1644_v3 = vrot.slane %v1643_v29, 4  ;;  %v1648_v31 = vrot.slane %v1646_v58, 5  ;;  %v1980_v6 = vshrl.u32 %v1951_v61, 16  ;;  %v1983_v9 = vshll.u32 %v1951_v61, 16 }
 0x245   : > { %2645 = vmatmul.msk.bf16.gmra.mxu2 %vm536_vm0, %v1413_v63  ;;  %v1812_v11 = vpack.c.b16 %v1807_v47, %v1806_v44  ;;  %v1635_v63 = vsel %vm3175_vm12, %v1630_v62, %v1634_v36  ;;  %v1651_v13 = vshrl.u32 %v1562_v52, 16  ;;  %v1654_v14 = vshll.u32 %v1562_v52, 16  ;;  %v1953_v7 = vld [vmem:[#allocation3 + $0x20] sm:$0xf]  ;;  %v1955_v58 = vld [vmem:[#allocation3 + $0x28] sm:$0xf] }
 0x246   : > { %v1968_v20 = vrot.slane %v1966_v0, 4  ;;  %v1971_v16 = vrot.slane %v1969_v2, 5  ;;  %v1649_v22 = vsel %vm3175_vm12, %v1644_v3, %v1648_v31  ;;  %v1982_v40 = vrot.slane %v1980_v6, 4 }
 0x247   : > { %v1985_v25 = vrot.slane %v1983_v9, 5  ;;  %v1684_v26 = vunpack.c.l.b16 %v1635_v63  ;;  %v1794_v60 = vrot.slane %v1563_v15, 5  ;;  %v1685_v10 = vunpack.c.l.b16 %v1649_v22 }
 0x248   : > { %v1653_v38 = vrot.slane %v1651_v13, 4  ;;  %v1656_v5 = vrot.slane %v1654_v14, 5  ;;  %v1972_v39 = vor.u32 %v1971_v16, %v1968_v20  ;;  %v1975_v48 = vshll.u32 %v3349_v24, 16 }
 0x249   : > { %2667 = vmatmul.msk.bf16.gmra.mxu3 %vm536_vm0, %v2660_v33  ;;  %v2680_v33 = vrot.slane %v1750_v17, 9  ;;  %v1986_v41 = vor.u32 %v1985_v25, %v1982_v40  ;;  %v1989_v18 = vshll.u32 %v3352_v32, 16  ;;  %v1690_v49 = vpack.c.b16 %v1685_v10, %v1684_v26  ;;  %v3370_v17 = vld [vmem:[#allocation3 + $0x2c] sm:$0x1]  ;;  %v1957_v10 = vld [vmem:[#allocation3 + $0x30] sm:$0xf] }
 0x24a   : > { %v1564_v4 = vld [vmem:[#allocation3 + $0x40] sm:$0xf]  ;;  %v1657_v50 = vor.u32 %v1656_v5, %v1653_v38  ;;  %v1660_v53 = vshll.u32 %v1563_v15, 16  ;;  %v1973_v55 = vrot.slane %v1972_v39, 4  ;;  %v1977_v56 = vrot.slane %v1975_v48, 5 }
 0x24b   : > { %v1751_v19 = vld [vmem:[#allocation3 + $0x40] sm:$0xe]  ;;  %v1565_v27 = vld [vmem:[#allocation3 + $0x44] sm:$0x1]  ;;  %v1665_v28 = vshrl.u32 %v1564_v4, 16  ;;  %v1668_v30 = vshll.u32 %v1564_v4, 16  ;;  %v1795_v46 = vsel %vm3258_vm15, %v2680_v33, %v1794_v60 }
 0x24c   : > { %2671 = vmatmul.msk.bf16.gmra.mxu0 %vm536_vm0, %v1689_v8  ;;  %v2769_v23 = vld [vmem:[#allocation3 + $0x3c] sm:$0xf0]  ;;  %v2681_v34 = vrot.slane %v1751_v19, 9  ;;  %v1798_v1 = vrot.slane %v1565_v27, 5  ;;  %v1987_v8 = vrot.slane %v1986_v41, 4  ;;  %v1991_v29 = vrot.slane %v1989_v18, 5 }
 0x24d   : > { %v2664_v35 = vor.u32 %v2769_v23, %v2663_v12  ;;  %v1667_v54 = vrot.slane %v1665_v28, 4  ;;  %v1670_v45 = vrot.slane %v1668_v30, 5  ;;  %v1674_v44 = vshll.u32 %v1565_v27, 16  ;;  %v3368_v15 = vld [vmem:[#allocation3 + $0x24] sm:$0x1] }
 0x24e   : > { %v1808_v47 = vunpack.c.l.b16 %v1795_v46  ;;  %v1994_v62 = vshrl.u32 %v1953_v7, 16  ;;  %v1997_v36 = vshll.u32 %v1953_v7, 16  ;;  %v2008_v52 = vshrl.u32 %v1955_v58, 16  ;;  %v1959_v38 = vld [vmem:[#allocation3 + $0x38] sm:$0xf] }
 0x24f   : > { %v1671_v59 = vor.u32 %v1670_v45, %v1667_v54  ;;  %v2011_v0 = vshll.u32 %v1955_v58, 16  ;;  %v1662_v2 = vrot.slane %v1660_v53, 5  ;;  %v1978_v3 = vsel %vm3175_vm12, %v1973_v55, %v1977_v56  ;;  %v2690_v5 = vld [vmem:[#allocation3 + $0x10] sm:$0xf]  ;;  %v2144_v48 = vld [vmem:[#allocation3 + $0x18] sm:$0xe] }
 0x250   : > { %v1992_v31 = vsel %vm3175_vm12, %v1987_v8, %v1991_v29  ;;  %v1658_v6 = vrot.slane %v1657_v50, 4  ;;  %v1996_v12 = vrot.slane %v1994_v62, 4  ;;  %v1999_v4 = vrot.slane %v1997_v36, 5  ;;  %v2143_v39 = vld [vmem:[#allocation3 + $0x10] sm:$0xe] }
 0x251   : > { %2685 = vmatmul.msk.bf16.gmra.mxu1 %vm536_vm0, %v1812_v11  ;;  %v1672_v9 = vrot.slane %v1671_v59, 4  ;;  %v1676_v11 = vrot.slane %v1674_v44, 5  ;;  %v2079_v13 = vunpack.c.l.b16 %v1978_v3  ;;  %v2080_v14 = vunpack.c.l.b16 %v1992_v31  ;;  %v915_v8 = vld [vmem:[#allocation3 + $0x48] sm:$0x1]  ;;  %v3391_v62 = vld [vmem:[#allocation3 + $0x34] sm:$0x1] }
 0x252   : > { %v2010_v20 = vrot.slane %v2008_v52, 4  ;;  %v2013_v16 = vrot.slane %v2011_v0, 5  ;;  %v1663_v19 = vsel %vm3175_vm12, %v1658_v6, %v1662_v2  ;;  %v2000_v23 = vor.u32 %v1999_v4, %v1996_v12  ;;  %v3393_v36 = vld [vmem:[#allocation3 + $0x3c] sm:$0x1]  ;;  %v947_v52 = vld [vmem:[#allocation3 + $0x4c] sm:$0x1] }
 0x253   : > { %v1677_v22 = vsel %vm3175_vm12, %v1672_v9, %v1676_v11  ;;  %v2003_v40 = vshll.u32 %v3368_v15, 16  ;;  %v2087_v25 = vpack.c.b16 %v2080_v14, %v2079_v13  ;;  %v2017_v27 = vshll.u32 %v3370_v17, 16 }
 0x254   : > { %v2014_v26 = vor.u32 %v2013_v16, %v2010_v20  ;;  %v1686_v28 = vunpack.c.l.b16 %v1663_v19  ;;  %v1687_v30 = vunpack.c.l.b16 %v1677_v22  ;;  %v2001_v33 = vrot.slane %v2000_v23, 4  ;;  %v2145_v20 = vld [vmem:[#allocation3 + $0x20] sm:$0xe]  ;;  %v2146_v16 = vld [vmem:[#allocation3 + $0x28] sm:$0xe] }
 0x255   : > { %2646 = vmatmul.msk.bf16.gmra.mxu2 %vm536_vm0, %v3313_v42  ;;  %v1799_v42 = vsel %vm3258_vm15, %v2681_v34, %v1798_v1  ;;  %v2005_v60 = vrot.slane %v2003_v40, 5  ;;  %v2019_v1 = vrot.slane %v2017_v27, 5  ;;  %v2022_v18 = vshrl.u32 %v1957_v10, 16  ;;  %v1961_v19 = vld [vmem:[#allocation3 + $0x40] sm:$0xf] }
 0x256   : > { %v1809_v61 = vunpack.c.l.b16 %v1799_v42  ;;  %v2015_v34 = vrot.slane %v2014_v26, 4  ;;  %v2025_v54 = vshll.u32 %v1957_v10, 16  ;;  %v2036_v46 = vshrl.u32 %v1959_v38, 16 }
 0x257   : > { %v2006_v41 = vsel %vm3175_vm12, %v2001_v33, %v2005_v60  ;;  %v2039_v42 = vshll.u32 %v1959_v38, 16  ;;  %v2713_v50 = vrot.slane %v2143_v39, 9  ;;  %v2169_v53 = vrot.slane %v3349_v24, 5 }
 0x258   : > { %v1813_v63 = vpack.c.b16 %v1809_v61, %v1808_v47  ;;  %v2020_v45 = vsel %vm3175_vm12, %v2015_v34, %v2019_v1  ;;  %v2714_v7 = vrot.slane %v2144_v48, 9  ;;  %v2173_v55 = vrot.slane %v3352_v32, 5 }
 0x259   : > { %2668 = vmatmul.msk.bf16.gmra.mxu3 %vm536_vm0, %v2664_v35  ;;  %v1691_v35 = vpack.c.b16 %v1687_v30, %v1686_v28  ;;  %v2081_v56 = vunpack.c.l.b16 %v2006_v41  ;;  %v2082_v29 = vunpack.c.l.b16 %v2020_v45  ;;  %v2024_v58 = vrot.slane %v2022_v18, 4  ;;  %v1962_v41 = vld [vmem:[#allocation3 + $0x44] sm:$0x1] }
 0x25a   : > { %v2027_v59 = vrot.slane %v2025_v54, 5  ;;  %v916_v44 = vsel %vm3069_vm5, 0, %v915_v8  ;;  %v2038_v47 = vrot.slane %v2036_v46, 4  ;;  %v2041_v61 = vrot.slane %v2039_v42, 5 }
 0x25b   : > { %917 = vst [vmem:[#allocation3 + $0x48] sm:$0x1] %v916_v44  ;;  %v2170_v24 = vsel %vm3258_vm15, %v2713_v50, %v2169_v53  ;;  %v2174_v32 = vsel %vm3258_vm15, %v2714_v7, %v2173_v55  ;;  %v2088_v0 = vpack.c.b16 %v2082_v29, %v2081_v56  ;;  %v2031_v37 = vshll.u32 %v3391_v62, 16  ;;  %v2148_v44 = vld [vmem:[#allocation3 + $0x38] sm:$0xe] }
 0x25c   : > { %2672 = vmatmul.msk.bf16.gmra.mxu0 %vm536_vm0, %v1690_v49  ;;  %v2028_v2 = vor.u32 %v2027_v59, %v2024_v58  ;;  %v2042_v3 = vor.u32 %v2041_v61, %v2038_v47  ;;  %v2045_v31 = vshll.u32 %v3393_v36, 16  ;;  %v948_v6 = vsel %vm3083_vm7, 0, %v947_v52  ;;  %v2147_v59 = vld [vmem:[#allocation3 + $0x30] sm:$0xe]  ;;  %v2772_v61 = vld [vmem:[#allocation3 + $0x34] sm:$0xf0] }
 0x25d   : > { %v2201_v9 = vunpack.c.l.b16 %v2170_v24  ;;  %v2202_v11 = vunpack.c.l.b16 %v2174_v32  ;;  %949 = vst [vmem:[#allocation3 + $0x4c] sm:$0x1] %v948_v6  ;;  %v2033_v12 = vrot.slane %v2031_v37, 5  ;;  %v2177_v23 = vrot.slane %v3368_v15, 5  ;;  %v2698_v47 = vld [vmem:[#allocation3 + $0x30] sm:$0xf] }
 0x25e   : > { %v2043_v4 = vrot.slane %v2042_v3, 4  ;;  %v2047_v13 = vrot.slane %v2045_v31, 5  ;;  %v2181_v40 = vrot.slane %v3370_v17, 5  ;;  %v2715_v26 = vrot.slane %v2145_v20, 9 }
 0x25f   : > { %v2209_v14 = vpack.c.b16 %v2202_v11, %v2201_v9  ;;  %v2716_v27 = vrot.slane %v2146_v16, 9  ;;  %v2050_v33 = vshrl.u32 %v1961_v19, 16  ;;  %v2053_v60 = vshll.u32 %v1961_v19, 16 }
 0x260   : > { %v2048_v30 = vsel %vm3175_vm12, %v2043_v4, %v2047_v13  ;;  %v2178_v15 = vsel %vm3258_vm15, %v2715_v26, %v2177_v23  ;;  %v2717_v52 = vrot.slane %v2147_v59, 9  ;;  %v2189_v37 = vrot.slane %v3393_v36, 5  ;;  %v2150_v23 = vld [vmem:[#allocation3 + $0x48] sm:$0xe] }
 0x261   : > { %2686 = vmatmul.msk.bf16.gmra.mxu1 %vm536_vm0, %v1813_v63  ;;  %v2029_v63 = vrot.slane %v2028_v2, 4  ;;  %v2182_v17 = vsel %vm3258_vm15, %v2716_v27, %v2181_v40  ;;  %v2084_v38 = vunpack.c.l.b16 %v2048_v30  ;;  %v2203_v54 = vunpack.c.l.b16 %v2178_v15  ;;  %v2702_v40 = vld [vmem:[#allocation3 + $0x40] sm:$0xf] }
 0x262   : > { %v1963_v22 = vld [vmem:[#allocation3 + $0x48] sm:$0xf]  ;;  %v2204_v45 = vunpack.c.l.b16 %v2182_v17  ;;  %v2718_v2 = vrot.slane %v2148_v44, 9  ;;  %v2699_v31 = vor.u32 %v2772_v61, %v2698_v47  ;;  %v2193_v26 = vrot.slane %v1962_v41, 5 }
 0x263   : > { %v2034_v28 = vsel %vm3175_vm12, %v2029_v63, %v2033_v12  ;;  %v2064_v34 = vshrl.u32 %v1963_v22, 16  ;;  %v2067_v1 = vshll.u32 %v1963_v22, 16  ;;  %v2149_v22 = vld [vmem:[#allocation3 + $0x40] sm:$0xe]  ;;  %v2720_v27 = vrot.slane %v2150_v23, 9 }
 0x264   : > { %v1964_v18 = vld [vmem:[#allocation3 + $0x4c] sm:$0x1]  ;;  %v2210_v55 = vpack.c.b16 %v2204_v45, %v2203_v54  ;;  %v2190_v21 = vsel %vm3258_vm15, %v2718_v2, %v2189_v37  ;;  %v2307_v45 = vsel %vm698_vm2, %v2289_v51, 0 }
 0x265   : > { %2647 = vmatmul.msk.bf16.gmra.mxu2 %vm536_vm0, %v3342_v57  ;;  %v2770_v57 = vld [vmem:[#allocation3 + $0x14] sm:$0xf0]  ;;  %v2066_v39 = vrot.slane %v2064_v34, 4  ;;  %v2069_v48 = vrot.slane %v2067_v1, 5  ;;  %v2073_v53 = vshll.u32 %v1964_v18, 16  ;;  %v2206_v13 = vunpack.c.l.b16 %v2190_v21  ;;  %2316 = vmatpush.bf16.msra.mxu1 %v2307_v45 }
 0x266   : > { %v2691_v49 = vor.u32 %v2770_v57, %v2690_v5  ;;  %v2052_v5 = vrot.slane %v2050_v33, 4  ;;  %v2055_v57 = vrot.slane %v2053_v60, 5 }
 0x267   : > { %v2070_v50 = vor.u32 %v2069_v48, %v2066_v39  ;;  %v2075_v58 = vrot.slane %v2073_v53, 5 }
 0x268   : > { %v2056_v42 = vor.u32 %v2055_v57, %v2052_v5 }
 0x269   : > { %2709 = vmatmul.msk.bf16.vlgmr.msra.gmra.mxu3 %vm536_vm0, %v2087_v25  ;;  %v2771_v25 = vld [vmem:[#allocation3 + $0x24] sm:$0xf0]  ;;  %v2071_v29 = vrot.slane %v2070_v50, 4 }
 0x26a   : > { %v2695_v10 = vor.u32 %v2771_v25, %v2694_v43  ;;  %v2057_v56 = vrot.slane %v2056_v42, 4  ;;  %v2773_v43 = vld [vmem:[#allocation3 + $0x44] sm:$0xf0]  ;;  %v2719_v25 = vrot.slane %v2149_v22, 9 }
 0x26b   : > { %v2076_v32 = vsel %vm3175_vm12, %v2071_v29, %v2075_v58  ;;  %v2703_v30 = vor.u32 %v2773_v43, %v2702_v40 }
 0x26c   : > { %2673 = vmatmul.msk.bf16.gmra.mxu0 %vm536_vm0, %v1691_v35  ;;  %v2083_v35 = vunpack.c.l.b16 %v2034_v28  ;;  %v2086_v11 = vunpack.c.l.b16 %v2076_v32  ;;  %v2197_v28 = vrot.slane %v1964_v18, 5  ;;  %v2194_v60 = vsel %vm3258_vm15, %v2719_v25, %v2193_v26 }
 0x26e   : > { %v2089_v46 = vpack.c.b16 %v2084_v38, %v2083_v35  ;;  %v2198_v34 = vsel %vm3258_vm15, %v2720_v27, %v2197_v28 }
 0x26f   : > { %v2208_v15 = vunpack.c.l.b16 %v2198_v34 }
 0x275   : > { %2704 = vmatmul.msk.bf16.vlgmr.msra.gmra.mxu2 %vm536_vm0, %v2691_v49  ;;  %v2059_v49 = vshll.u32 %v1962_v41, 16 }
 0x277   : > { %v2061_v8 = vrot.slane %v2059_v49, 5 }
 0x279   : > { %2710 = vmatmul.msk.bf16.gmra.mxu3 %vm536_vm0, %v2088_v0  ;;  %v2062_v24 = vsel %vm3175_vm12, %v2057_v56, %v2061_v8  ;;  %v2185_v0 = vrot.slane %v3391_v62, 5 }
 0x27a   : > { %v2085_v9 = vunpack.c.l.b16 %v2062_v24 }
 0x27b   : > { %v2186_v12 = vsel %vm3258_vm15, %v2717_v52, %v2185_v0 }
 0x27c   : > { %2722 = vmatmul.msk.bf16.vlgmr.msra.gmra.mxu0 %vm536_vm0, %v2209_v14  ;;  %v2090_v4 = vpack.c.b16 %v2086_v11, %v2085_v9  ;;  %v2205_v62 = vunpack.c.l.b16 %v2186_v12 }
 0x27e   : > { %v2211_v16 = vpack.c.b16 %v2206_v13, %v2205_v62 }
 0x284   : > { %v1333_v7 = vpop.f32.mrf.mxu3 }
 0x285   : > { %2705 = vmatmul.msk.bf16.gmra.mxu2 %vm536_vm0, %v2695_v10  ;;  %v2207_v10 = vunpack.c.l.b16 %v2194_v60  ;;  %v1323_v41 = vpop.f32.mrf.mxu1 }
 0x287   : > { %v2212_v38 = vpack.c.b16 %v2208_v15, %v2207_v10 }
 0x289   : > { %2711 = vmatmul.msk.bf16.gmra.mxu3 %vm536_vm0, %v2089_v46 }
 0x28c   : > { %2723 = vmatmul.msk.bf16.gmra.mxu0 %vm536_vm0, %v2210_v55  ;;  %v1335_v63 = vpop.f32.mrf.mxu3 }
 0x28d   : > { %v1325_v53 = vpop.f32.mrf.mxu1 }
 0x28f   : > { %v1259_v14 = vpop.f32.mrf.mxu0 }
 0x290   : > { %v1269_v3 = vpop.f32.mrf.mxu2  ;;  %v1324_v46 = vadd.f32 %v1323_v41, %v1259_v14 }
 0x291   : > { %v3425_v6 = vadd.f32 %v1333_v7, %v1269_v3 }
 0x295   : > { %2706 = vmatmul.msk.bf16.gmra.mxu2 %vm536_vm0, %v2699_v31 }
 0x297   : > { %v1261_v33 = vpop.f32.mrf.mxu0 }
 0x298   : > { %v1271_v36 = vpop.f32.mrf.mxu2  ;;  %v1326_v26 = vadd.f32 %v1325_v53, %v1261_v33  ;;  %v3466_v33 = vld [vmem:[%s3530_s7] ss:$0 sm:$0xff] }
 0x299   : > { %v3432_v20 = vadd.f32 %v1335_v63, %v1271_v36  ;;  %2712 = vmatmul.msk.bf16.gmra.mxu3 %vm536_vm0, %v2090_v4 }
 0x29c   : > { %v1338_v19 = vpop.f32.mrf.mxu3  ;;  %2724 = vmatmul.msk.bf16.gmra.mxu0 %vm536_vm0, %v2211_v16 }
 0x29e   : > { %v1328_v59 = vpop.f32.mrf.mxu1 }
 0x2a4   : > { %v1340_v1 = vpop.f32.mrf.mxu3 }
 0x2a5   : > { %2707 = vmatmul.msk.bf16.gmra.mxu2 %vm536_vm0, %v2703_v30 }
 0x2a6   : > { %v1330_v4 = vpop.f32.mrf.mxu1 }
 0x2a8   : > { %v1274_v17 = vpop.f32.mrf.mxu2 }
 0x2a9   : > { %v1339_v35 = vadd.f32 %v1338_v19, %v1274_v17  ;;  %v1264_v5 = vpop.f32.mrf.mxu0 }
 0x2aa   : > { %v1329_v44 = vadd.f32 %v1328_v59, %v1264_v5 }
 0x2ac   : > { %v1522_v57 = vpop.f32.mrf.mxu3  ;;  %2725 = vmatmul.msk.bf16.gmra.mxu0 %vm536_vm0, %v2212_v38 }
 0x2ae   : > { %v1838_v36 = vpop.f32.mrf.mxu1 }
 0x2b0   : > { %v1276_v39 = vpop.f32.mrf.mxu2 }
 0x2b1   : > { %v3442_v48 = vadd.f32 %v1340_v1, %v1276_v39  ;;  %v1266_v18 = vpop.f32.mrf.mxu0 }
 0x2b2   : > { %v1331_v41 = vadd.f32 %v1330_v4, %v1266_v18 }
 0x2b4   : > { %v1524_v54 = vpop.f32.mrf.mxu3 }
 0x2b8   : > { %v1440_v42 = vpop.f32.mrf.mxu2 }
 0x2b9   : > { %v1460_v49 = vadd.f32 %v1440_v42, %v1324_v46  ;;  %v1716_v7 = vpop.f32.mrf.mxu0 }
 0x2bb   : > { %v1542_v50 = vadd.f32 %v1522_v57, %v1460_v49 }
 0x2bc   : > { %v1527_v56 = vpop.f32.mrf.mxu3 }
 0x2bd   : > { %v1736_v55 = vadd.f32 %v1716_v7, %v1542_v50 }
 0x2bf   : > { %v1858_v60 = vadd.f32 %v1838_v36, %v1736_v55 }
 0x2c0   : > { %v1442_v8 = vpop.f32.mrf.mxu2 }
 0x2c1   : > { %v1718_v29 = vpop.f32.mrf.mxu0  ;;  %v1461_v27 = vadd.f32 %v1442_v8, %v1326_v26 }
 0x2c3   : > { %v1543_v34 = vadd.f32 %v1524_v54, %v1461_v27 }
 0x2c4   : > { %v1529_v58 = vpop.f32.mrf.mxu3 }
 0x2c5   : > { %v1737_v17 = vadd.f32 %v1718_v29, %v1543_v34 }
 0x2c8   : > { %v1445_v47 = vpop.f32.mrf.mxu2 }
 0x2c9   : > { %v1462_v61 = vadd.f32 %v1445_v47, %v1329_v44  ;;  %v1721_v32 = vpop.f32.mrf.mxu0 }
 0x2cb   : > { %v1544_v24 = vadd.f32 %v1527_v56, %v1462_v61 }
 0x2cc   : > { %v1532_v0 = vpop.f32.mrf.mxu3 }
 0x2cd   : > { %v1738_v52 = vadd.f32 %v1721_v32, %v1544_v24 }
 0x2d0   : > { %v1447_v2 = vpop.f32.mrf.mxu2 }
 0x2d1   : > { %v1723_v37 = vpop.f32.mrf.mxu0  ;;  %v1463_v46 = vadd.f32 %v1447_v2, %v1331_v41 }
 0x2d3   : > { %v1545_v55 = vadd.f32 %v1529_v58, %v1463_v46 }
 0x2d4   : > { %v3448_v3 = vpop.f32.mrf.mxu3 }
 0x2d5   : > { %v1739_v47 = vadd.f32 %v1723_v37, %v1545_v55 }
 0x2d8   : > { %v1450_v31 = vpop.f32.mrf.mxu2 }
 0x2d9   : > { %v1464_v9 = vadd.f32 %v1450_v31, %v3425_v6  ;;  %v1726_v63 = vpop.f32.mrf.mxu0  ;;  %v1840_v6 = vpop.f32.mrf.mxu1 }
 0x2da   : > { %v1859_v5 = vadd.f32 %v1840_v6, %v1737_v17 }
 0x2db   : > { %v1546_v11 = vadd.f32 %v1532_v0, %v1464_v9 }
 0x2dc   : > { %v1537_v21 = vpop.f32.mrf.mxu3 }
 0x2dd   : > { %v3451_v12 = vadd.f32 %v1726_v63, %v1546_v11 }
 0x2e0   : > { %v1452_v62 = vpop.f32.mrf.mxu2 }
 0x2e1   : > { %v3453_v13 = vpop.f32.mrf.mxu0  ;;  %v1843_v15 = vpop.f32.mrf.mxu1  ;;  %v1465_v58 = vadd.f32 %v1452_v62, %v3432_v20 }
 0x2e2   : > { %v1860_v7 = vadd.f32 %v1843_v15, %v1738_v52 }
 0x2e4   : > { %v3455_v14 = vpop.f32.mrf.mxu3 }
 0x2e8   : > { %v1455_v16 = vpop.f32.mrf.mxu2 }
 0x2e9   : > { %v1466_v19 = vadd.f32 %v1455_v16, %v1339_v35  ;;  %v1731_v23 = vpop.f32.mrf.mxu0  ;;  %v1845_v54 = vpop.f32.mrf.mxu1  ;;  %v1547_v16 = vadd.f32 %v3448_v3, %v1465_v58 }
 0x2ea   : > { %v1861_v2 = vadd.f32 %v1845_v54, %v1739_v47 }
 0x2eb   : > { %v1548_v22 = vadd.f32 %v1537_v21, %v1466_v19  ;;  %v1741_v27 = vadd.f32 %v3453_v13, %v1547_v16 }
 0x2ec   : > { %v2115_v43 = vpop.f32.mrf.mxu3 }
 0x2ed   : > { %v3457_v40 = vadd.f32 %v1731_v23, %v1548_v22 }
 0x2f0   : > { %v3459_v25 = vpop.f32.mrf.mxu2 }
 0x2f1   : > { %v3461_v28 = vpop.f32.mrf.mxu0  ;;  %v1848_v0 = vpop.f32.mrf.mxu1  ;;  %v1467_v15 = vadd.f32 %v3459_v25, %v3442_v48 }
 0x2f2   : > { %v1862_v37 = vadd.f32 %v1848_v0, %v3451_v12 }
 0x2f4   : > { %v2117_v30 = vpop.f32.mrf.mxu3 }
 0x2f8   : > { %v1921_v1 = vpop.f32.mrf.mxu2 }
 0x2f9   : > { %v1941_v10 = vadd.f32 %v1921_v1, %v1858_v60  ;;  %v2237_v35 = vpop.f32.mrf.mxu0  ;;  %v1850_v22 = vpop.f32.mrf.mxu1 }
 0x2fa   : > { %v1863_v34 = vadd.f32 %v1850_v22, %v1741_v27 }
 0x2fb   : > { %v2135_v38 = vadd.f32 %v2115_v43, %v1941_v10 }
 0x2fc   : > { %v2120_v39 = vpop.f32.mrf.mxu3 }
 0x2fd   : > { %v2257_v51 = vadd.f32 %v2237_v35, %v2135_v38 }
 0x2ff   : > { %v2269_v50 = vadd.f32 %v3466_v33, %v2257_v51 }
 0x300   : > { %v1923_v57 = vpop.f32.mrf.mxu2 }
 0x301   : > { %v1942_v45 = vadd.f32 %v1923_v57, %v1859_v5  ;;  %v2239_v49 = vpop.f32.mrf.mxu0  ;;  %v2277_v18 = vmax.f32 %v2269_v50, 0.0  ;;  %v1853_v3 = vpop.f32.mrf.mxu1  ;;  %v1549_v57 = vadd.f32 %v3455_v14, %v1467_v15 }
 0x302   : > { %v1864_v13 = vadd.f32 %v1853_v3, %v3457_v40 }
 0x303   : > { %v2136_v42 = vadd.f32 %v2117_v30, %v1942_v45  ;;  %v1743_v54 = vadd.f32 %v3461_v28, %v1549_v57 }
 0x304   : > { %v2122_v44 = vpop.f32.mrf.mxu3 }
 0x305   : > { %v2258_v53 = vadd.f32 %v2239_v49, %v2136_v42 }
 0x307   : > { %v2270_v56 = vadd.f32 %v3466_v33, %v2258_v53 }
 0x308   : > { %v1926_v8 = vpop.f32.mrf.mxu2 }
 0x309   : > { %v2278_v29 = vmax.f32 %v2270_v56, 0.0  ;;  %v1943_v59 = vadd.f32 %v1926_v8, %v1860_v7  ;;  %v2242_v24 = vpop.f32.mrf.mxu0  ;;  %v1855_v48 = vpop.f32.mrf.mxu1 }
 0x30a   : > { %v1865_v53 = vadd.f32 %v1855_v48, %v1743_v54 }
 0x30b   : > { %v2285_v61 = vpack.c.bf16 %v2278_v29, %v2277_v18  ;;  %v2137_v32 = vadd.f32 %v2120_v39, %v1943_v59 }
 0x30c   : > { %v2125_v21 = vpop.f32.mrf.mxu3 }
 0x30d   : > { %2726 = vmatmul.msk.bf16.vlgmr.msra.gmra.mxu1 %vm536_vm0, %v2285_v61  ;;  %v2259_v9 = vadd.f32 %v2242_v24, %v2137_v32  ;;  %v2829_v61 = vld [vmem:[%s3531_s8] ss:$0 sm:$0xff] }
 0x30f   : > { %v2271_v36 = vadd.f32 %v3466_v33, %v2259_v9 }
 0x310   : > { %v1928_v31 = vpop.f32.mrf.mxu2 }
 0x311   : > { %v1944_v11 = vadd.f32 %v1928_v31, %v1861_v2  ;;  %v2244_v63 = vpop.f32.mrf.mxu0  ;;  %v2279_v6 = vmax.f32 %v2271_v36, 0.0 }
 0x313   : > { %v2138_v52 = vadd.f32 %v2122_v44, %v1944_v11 }
 0x314   : > { %v2127_v60 = vpop.f32.mrf.mxu3 }
 0x315   : > { %v2260_v4 = vadd.f32 %v2244_v63, %v2138_v52 }
 0x317   : > { %v2272_v19 = vadd.f32 %v3466_v33, %v2260_v4 }
 0x318   : > { %v1931_v23 = vpop.f32.mrf.mxu2 }
 0x319   : > { %v1945_v43 = vadd.f32 %v1931_v23, %v1862_v37  ;;  %v2280_v26 = vmax.f32 %v2272_v19, 0.0  ;;  %v2247_v62 = vpop.f32.mrf.mxu0 }
 0x31b   : > { %v2286_v20 = vpack.c.bf16 %v2280_v26, %v2279_v6  ;;  %v2139_v30 = vadd.f32 %v2125_v21, %v1945_v43 }
 0x31c   : > { %v2130_v41 = vpop.f32.mrf.mxu3 }
 0x31d   : > { %2727 = vmatmul.msk.bf16.gmra.mxu1 %vm536_vm0, %v2286_v20  ;;  %v2261_v12 = vadd.f32 %v2247_v62, %v2139_v30 }
 0x31f   : > { %v2273_v5 = vadd.f32 %v3466_v33, %v2261_v12 }
 0x320   : > { %v1933_v1 = vpop.f32.mrf.mxu2 }
 0x321   : > { %v1946_v10 = vadd.f32 %v1933_v1, %v1863_v34  ;;  %v2249_v35 = vpop.f32.mrf.mxu0  ;;  %v2281_v46 = vmax.f32 %v2273_v5, 0.0 }
 0x323   : > { %v2140_v17 = vadd.f32 %v2127_v60, %v1946_v10 }
 0x324   : > { %v2132_v55 = vpop.f32.mrf.mxu3 }
 0x325   : > { %v2262_v38 = vadd.f32 %v2249_v35, %v2140_v17 }
 0x327   : > { %v2274_v39 = vadd.f32 %v3466_v33, %v2262_v38 }
 0x328   : > { %v1936_v51 = vpop.f32.mrf.mxu2 }
 0x329   : > { %v1947_v45 = vadd.f32 %v1936_v51, %v1864_v13  ;;  %v2282_v42 = vmax.f32 %v2274_v39, 0.0  ;;  %v2252_v25 = vpop.f32.mrf.mxu0 }
 0x32b   : > { %v2287_v49 = vpack.c.bf16 %v2282_v42, %v2281_v46  ;;  %v2141_v50 = vadd.f32 %v2130_v41, %v1947_v45 }
 0x32d   : > { %2728 = vmatmul.msk.bf16.gmra.mxu1 %vm536_vm0, %v2287_v49  ;;  %v2263_v40 = vadd.f32 %v2252_v25, %v2141_v50 }
 0x32f   : > { %v2275_v29 = vadd.f32 %v3466_v33, %v2263_v40 }
 0x330   : > { %v1938_v7 = vpop.f32.mrf.mxu2 }
 0x331   : > { %v1948_v14 = vadd.f32 %v1938_v7, %v1865_v53  ;;  %v2254_v8 = vpop.f32.mrf.mxu0  ;;  %v2283_v59 = vmax.f32 %v2275_v29, 0.0 }
 0x333   : > { %v2142_v56 = vadd.f32 %v2132_v55, %v1948_v14 }
 0x335   : > { %v2264_v18 = vadd.f32 %v2254_v8, %v2142_v56 }
 0x337   : > { %v2276_v28 = vadd.f32 %v3466_v33, %v2264_v18 }
 0x339   : > { %v2284_v44 = vmax.f32 %v2276_v28, 0.0 }
 0x33b   : > { %v2288_v47 = vpack.c.bf16 %v2284_v44, %v2283_v59 }
 0x33d   : > { %2729 = vmatmul.msk.bf16.gmra.mxu1 %vm536_vm0, %v2288_v47 }
 0x38a   : > { %v2318_v24 = vpop.f32.mrf.mxu1 }
 0x38b   : > { %v2319_v32 = vadd.f32 %v2829_v61, %v2318_v24 }
 0x38d   : > { %2339 = vst.msk [vmem:[%s2993_s28] sm:$0xff] %vm2338_vm1, %v2319_v32 }
 0x392   : > { %v2320_v0 = vpop.f32.mrf.mxu1 }
 0x393   : > { %v2321_v2 = vadd.f32 %v2829_v61, %v2320_v0 }
 0x395   : > { %2340 = vst.msk [vmem:[%s2993_s28 + $0x8] sm:$0xff] %vm2338_vm1, %v2321_v2 }
 0x39a   : > { %v2323_v33 = vpop.f32.mrf.mxu1 }
 0x39b   : > { %v2324_v31 = vadd.f32 %v2829_v61, %v2323_v33 }
 0x39d   : > { %2341 = vst.msk [vmem:[%s2993_s28 + $0x10] sm:$0xff] %vm2338_vm1, %v2324_v31 }
 0x3a2   : > { %v2325_v9 = vpop.f32.mrf.mxu1 }
 0x3a3   : > { %v2326_v11 = vadd.f32 %v2829_v61, %v2325_v9 }
 0x3a5   : > { %2342 = vst.msk [vmem:[%s2993_s28 + $0x18] sm:$0xff] %vm2338_vm1, %v2326_v11 }
 0x3aa   : > { %v2328_v58 = vpop.f32.mrf.mxu1 }
 0x3ab   : > { %v2329_v52 = vadd.f32 %v2829_v61, %v2328_v58 }
 0x3ad   : > { %2343 = vst.msk [vmem:[%s2993_s28 + $0x20] sm:$0xff] %vm2338_vm1, %v2329_v52 }
 0x3b2   : > { %v2330_v63 = vpop.f32.mrf.mxu1 }
 0x3b3   : > { %v2331_v21 = vadd.f32 %v2829_v61, %v2330_v63 }
 0x3b5   : > { %2344 = vst.msk [vmem:[%s2993_s28 + $0x28] sm:$0xff] %vm2338_vm1, %v2331_v21 }
 0x3ba   : > { %v2333_v4 = vpop.f32.mrf.mxu1 }
 0x3bb   : > { %v2334_v36 = vadd.f32 %v2829_v61, %v2333_v4 }
 0x3bd   : > { %2345 = vst.msk [vmem:[%s2993_s28 + $0x30] sm:$0xff] %vm2338_vm1, %v2334_v36 }
 0x3c2   : > { %v2335_v37 = vpop.f32.mrf.mxu1 }
 0x3c3   : > { %v2336_v16 = vadd.f32 %v2829_v61, %v2335_v37 }
 0x3c5   : > { %2346 = vst.msk [vmem:[%s2993_s28 + $0x38] sm:$0xff] %vm2338_vm1, %v2336_v16 }
 0x3c6 PF: > { %s19_s13 = sadd.s32 1, %s2868_s13   ;;  %s3549_s10 = sld [smem:[#allocation4_spill]] }
 0x3c7   : > { %p16_p3 = scmp.ge.s32.totalorder %s19_s13, 10   ;;  %s3550_s24 = sld [smem:[#allocation5_spill]] }
 0x3c8   : > { %s3551_s12 = sld [smem:[#allocation6_spill]]  ;;  %s3552_s30 = smov %s2860_s11 }
 0x3c9   :  { %18 = sbr.rel (!%p16_p3) target bundleno = 3 (0x3), region = 113 }
 0x3cd   : > { %s3553_s11 = smov %s3550_s24 }

</bundles_post_ra>
